<compile_context>
chip_gen: v7x
topology: tpu7x:2x2x1
jax: 0.10.0
libtpu: 0.0.40
codegen_flags: <defaults>
</compile_context>

<pallas_src>
import functools

import numpy as np
import jax
import jax.numpy as jnp
from jax import lax
from jax.experimental import pallas as pl
from jax.experimental.pallas import tpu as pltpu


# ---------------------------------------------------------------- helpers ---
def _round_up(x, m):
    return int(pl.cdiv(x, m)) * m


def center_size(boxes):
    # (x1, y1, x2, y2) -> (cx, cy, w, h)
    cx = (boxes[:, 0] + boxes[:, 2]) * 0.5
    cy = (boxes[:, 1] + boxes[:, 3]) * 0.5
    w = boxes[:, 2] - boxes[:, 0] + 1.0
    h = boxes[:, 3] - boxes[:, 1] + 1.0
    return jnp.stack([cx, cy, w, h], axis=1)


# ------------------------------------------------- fused object-path kernel --
def _object_path_kernel(
    fmap_ref, logits_ref, cxcywh_ref,
    embed_ref, posw_ref, posb_ref,
    ocwf_ref, ocwe_ref, ocwp_ref, ocb_ref,
    dwf_ref, dwe_ref, dwp_ref, dwc_ref, db_ref,
    ewe2_ref, ewf_ref, ewc_ref, eb_ref,
    pw_ref, pb_ref,
    dists_ref, preds_ref, edge_ref):
    f32 = jnp.float32
    bf16 = jnp.bfloat16

    fmap = fmap_ref[...]
    logits = logits_ref[...]

    # softmax(obj_logits) @ obj_embed.weight   (bf16 MXU operands, f32 accum)
    m = jnp.max(logits, axis=-1, keepdims=True)
    e = jnp.exp(logits - m)
    p = e / jnp.sum(e, axis=-1, keepdims=True)
    embed_w = embed_ref[...]                               # [C, E] bf16
    obj_embed = jnp.dot(p.astype(bf16), embed_w, preferred_element_type=f32)

    # pos_embed: BatchNorm1d folded into the 4->128 linear (ReLU; Dropout=eval)
    pos = jnp.maximum(
        jnp.dot(cxcywh_ref[...].astype(bf16), posw_ref[...],
                preferred_element_type=f32) + posb_ref[...], 0.0)

    fmap16 = fmap.astype(bf16)
    embed16 = obj_embed.astype(bf16)
    pos16 = pos.astype(bf16)

    # obj_ctx: concat([fmap, obj_embed, pos]) @ W  == split-weight accumulation
    # TODO(synk): stand-in for AlternatingHighwayLSTM (obj_ctx_rnn)
    obj_ctx = (jnp.dot(fmap16, ocwf_ref[...], preferred_element_type=f32)
               + jnp.dot(embed16, ocwe_ref[...], preferred_element_type=f32)
               + jnp.dot(pos16, ocwp_ref[...], preferred_element_type=f32)
               + ocb_ref[...])

    # decoder logits kept in f32 so argmax / obj_preds cannot flip under bf16.
    # TODO(synk): stand-in for DecoderRNN (pass_in_obj_feats_to_decoder=True)
    dists = (jnp.dot(fmap, dwf_ref[...], preferred_element_type=f32)
             + jnp.dot(obj_embed, dwe_ref[...], preferred_element_type=f32)
             + jnp.dot(pos, dwp_ref[...], preferred_element_type=f32)
             + jnp.dot(obj_ctx, dwc_ref[...], preferred_element_type=f32)
             + db_ref[...])
    dists_ref[...] = dists

    # obj_preds = argmax over classes 1..C-1 (+1), done by masking column 0.
    ncls = dists.shape[-1]
    col = lax.broadcasted_iota(jnp.int32, dists.shape, 1)
    masked = jnp.where(col == 0, -jnp.inf, dists)
    best = jnp.max(masked, axis=-1, keepdims=True)
    # first index attaining the max (matches jnp.argmax tie-breaking)
    preds_f = jnp.min(jnp.where(masked == best, col.astype(f32), float(ncls)),
                      axis=-1, keepdims=True)
    preds = preds_f.astype(jnp.int32)
    preds_ref[...] = preds

    # obj_embed2 = obj_embed2.weight[preds] via one-hot matmul (no dyn gather)
    onehot = (col == preds).astype(bf16)
    obj_embed2 = jnp.dot(onehot, embed_w, preferred_element_type=f32)

    # edge_ctx: concat([obj_embed2, fmap, obj_ctx]) @ W  (split-weight)
    # TODO(synk): stand-in for edge_ctx_rnn (pass_in_obj_feats_to_edge=True)
    edge_ctx = (jnp.dot(obj_embed2.astype(bf16), ewe2_ref[...],
                        preferred_element_type=f32)
                + jnp.dot(fmap16, ewf_ref[...], preferred_element_type=f32)
                + jnp.dot(obj_ctx.astype(bf16), ewc_ref[...],
                          preferred_element_type=f32)
                + eb_ref[...])

    # post_lstm
    edge_ref[...] = (jnp.dot(edge_ctx.astype(bf16), pw_ref[...],
                             preferred_element_type=f32) + pb_ref[...])


def object_path(prep, obj_fmap, obj_logits, cxcywh, *, tile_n=8):
    """One pallas_call for the whole LinearizedContext + post_lstm path."""
    N, OBJ = obj_fmap.shape
    C = obj_logits.shape[1]
    P2 = prep["post_w"].shape[1]

    n_pad = _round_up(N, tile_n)
    if n_pad != N:
        pad = ((0, n_pad - N), (0, 0))
        obj_fmap = jnp.pad(obj_fmap, pad)
        obj_logits = jnp.pad(obj_logits, pad)
        cxcywh = jnp.pad(cxcywh, pad)

    grid = (n_pad // tile_n,)

    def row(feat):
        return pl.BlockSpec((tile_n, feat), lambda i: (i, 0))

    def res(a):                                   # weight resident across grid
        return pl.BlockSpec(a.shape, lambda i: (0, 0))

    weights = (prep["embed"], prep["pos_w"], prep["pos_b"],
               prep["ocw_f"], prep["ocw_e"], prep["ocw_p"], prep["oc_b"],
               prep["dw_f"], prep["dw_e"], prep["dw_p"], prep["dw_c"],
               prep["dec_b"],
               prep["ew_e2"], prep["ew_f"], prep["ew_c"], prep["edge_b"],
               prep["post_w"], prep["post_b"])

    dists, preds, edge_rep = pl.pallas_call(
        _object_path_kernel,
        grid=grid,
        in_specs=[row(OBJ), row(C), row(4)] + [res(w) for w in weights],
        out_specs=(row(C), row(1), row(P2)),
        out_shape=(jax.ShapeDtypeStruct((n_pad, C), jnp.float32),
                   jax.ShapeDtypeStruct((n_pad, 1), jnp.int32),
                   jax.ShapeDtypeStruct((n_pad, P2), jnp.float32)),
        compiler_params=pltpu.CompilerParams(
            dimension_semantics=("parallel",)),
    )(obj_fmap, obj_logits, cxcywh, *weights)

    return dists[:N], preds[:N, 0], edge_rep[:N]


# --------------------------------------------------- fused relation kernel ---
def _rel_kernel(subj_ref, obj_ref, vr_ref, fb_ref, w_ref, b_ref, out_ref):
    # limit_vision already folded into vr (lanes >= limit hold 1.0)
    prod = jnp.tanh(subj_ref[...] * obj_ref[...] * vr_ref[...])    # use_tanh
    out_ref[...] = (jnp.dot(prod.astype(jnp.bfloat16), w_ref[...],
                            preferred_element_type=jnp.float32)
                    + b_ref[...] + fb_ref[...])                    # + freq bias


def rel_head(subj_g, obj_g, vr_eff, fb, rel_w, rel_b, *, tile_r=16):
    """Relation head tiled over relations; rel_compress weight stays resident.

    NOTE: at production sizes (P=4096) size tile_r for v7x's 64 MiB VMEM:
    ~256 rows keeps 3 double-buffered f32 row inputs under the scoped limit.
    """
    R, P = subj_g.shape
    nrp = rel_w.shape[1]
    r_pad = _round_up(R, tile_r)
    if r_pad != R:
        pad = ((0, r_pad - R), (0, 0))
        subj_g = jnp.pad(subj_g, pad)
        obj_g = jnp.pad(obj_g, pad)
        vr_eff = jnp.pad(vr_eff, pad)
        fb = jnp.pad(fb, pad)

    grid = (r_pad // tile_r,)
    row = lambda feat: pl.BlockSpec((tile_r, feat), lambda i: (i, 0))
    res = lambda a: pl.BlockSpec(a.shape, lambda i: (0, 0))

    out = pl.pallas_call(
        _rel_kernel,
        grid=grid,
        in_specs=[row(P), row(P), row(P), row(nrp), res(rel_w), res(rel_b)],
        out_specs=row(nrp),
        out_shape=jax.ShapeDtypeStruct((r_pad, nrp), jnp.float32),
        compiler_params=pltpu.CompilerParams(
            dimension_semantics=("parallel",)),
    )(subj_g, obj_g, vr_eff, fb, rel_w, rel_b)
    return out[:R]


# ---------------------------------------------------------------- params ----
def init_params(key, *, C, NR, E, H, P, OBJ):
    ks = jax.random.split(key, 12)
    std = 0.02
    return dict(
        embed=jax.random.normal(ks[0], (C, E), jnp.float32) * std,  # obj_embed == obj_embed2
        bn_gamma=jnp.ones((4,), jnp.float32),
        bn_beta=jnp.zeros((4,), jnp.float32),
        bn_mean=jnp.zeros((4,), jnp.float32),
        bn_var=jnp.ones((4,), jnp.float32),
        pos_w=jax.random.normal(ks[1], (4, 128), jnp.float32) * std,
        pos_b=jnp.zeros((128,), jnp.float32),
        obj_ctx_w=jax.random.normal(ks[2], (OBJ + E + 128, H), jnp.float32) * std,
        obj_ctx_b=jnp.zeros((H,), jnp.float32),
        dec_w=jax.random.normal(ks[3], (OBJ + E + 128 + H, C), jnp.float32) * std,
        dec_b=jnp.zeros((C,), jnp.float32),
        edge_w=jax.random.normal(ks[4], (E + OBJ + H, H), jnp.float32) * std,
        edge_b=jnp.zeros((H,), jnp.float32),
        post_w=jax.random.normal(ks[5], (H, 2 * P), jnp.float32) * (10.0 * np.sqrt(1.0 / H)),
        post_b=jnp.zeros((2 * P,), jnp.float32),
        rel_w=jax.random.normal(ks[6], (P, NR), jnp.float32) * np.sqrt(2.0 / (P + NR)),
        rel_b=jnp.zeros((NR,), jnp.float32),
        freq_bias=jax.random.normal(ks[7], (C * C, NR), jnp.float32) * std,
    )


def prepare_params(params, *, OBJ, E, H, P, NR, C):
    """Kernel-ready params: BN folded into pos linear, weights split along the
    concat boundaries (no in-kernel concats), bf16 MXU operands (decoder and
    biases kept f32), rel/freq tables lane-padded to a multiple of 128."""
    bf = jnp.bfloat16
    nr_pad = _round_up(NR, 128)

    scale = params["bn_gamma"] * lax.rsqrt(params["bn_var"] + 1e-5)
    shift = params["bn_beta"] - params["bn_mean"] * scale
    pos_w_eff = params["pos_w"] * scale[:, None]
    pos_b_eff = params["pos_b"] + shift @ params["pos_w"]

    ocw, dw, ew = params["obj_ctx_w"], params["dec_w"], params["edge_w"]
    return dict(
        embed=params["embed"].astype(bf),
        pos_w=pos_w_eff.astype(bf), pos_b=pos_b_eff.reshape(1, -1),
        ocw_f=ocw[:OBJ].astype(bf), ocw_e=ocw[OBJ:OBJ + E].astype(bf),
        ocw_p=ocw[OBJ + E:].astype(bf),
        oc_b=params["obj_ctx_b"].reshape(1, -1),
        dw_f=dw[:OBJ], dw_e=dw[OBJ:OBJ + E],
        dw_p=dw[OBJ + E:OBJ + E + 128], dw_c=dw[OBJ + E + 128:],
        dec_b=params["dec_b"].reshape(1, -1),
        ew_e2=ew[:E].astype(bf), ew_f=ew[E:E + OBJ].astype(bf),
        ew_c=ew[E + OBJ:].astype(bf),
        edge_b=params["edge_b"].reshape(1, -1),
        post_w=params["post_w"].astype(bf),
        post_b=params["post_b"].reshape(1, -1),
        rel_w=jnp.pad(params["rel_w"], ((0, 0), (0, nr_pad - NR))).astype(bf),
        rel_b=jnp.pad(params["rel_b"], (0, nr_pad - NR)).reshape(1, -1),
        freq_bias=jnp.pad(params["freq_bias"], ((0, 0), (0, nr_pad - NR))),
    )


# ---------------------------------------------------------------- forward ---
def rel_model_forward(prep, obj_fmap, obj_logits, boxes, rel_inds, vr, *, C, P, NR):
    """Eval-mode forward of the RelModel head (sgcls, use_vision, limit_vision,
    use_tanh, use_bias)."""
    cxcywh = center_size(boxes)
    obj_dists2, obj_preds, edge_rep = object_path(prep, obj_fmap, obj_logits, cxcywh)

    N = obj_fmap.shape[0]
    edge_rep = edge_rep.reshape(N, 2, P)
    subj_rep = edge_rep[:, 0]
    obj_rep = edge_rep[:, 1]

    # TODO(synk): at production sizes these row gathers + freq-bias lookup
    # should move in-kernel via PrefetchScalarGridSpec-driven row DMA to avoid
    # materializing (R, P) activations in HBM; kept as fused XLA gathers here.
    subj_g = subj_rep[rel_inds[:, 1]]
    obj_g = obj_rep[rel_inds[:, 2]]
    fb = prep["freq_bias"][obj_preds[rel_inds[:, 1]] * C + obj_preds[rel_inds[:, 2]]]

    # limit_vision=True: only the first P//2 channels are modulated by vr.
    # Fold the mask into vr at trace time so the kernel has no iota/select.
    limit = P // 2
    vr_eff = jnp.where(jnp.arange(P)[None, :] < limit, vr, jnp.float32(1.0))

    rel_pad = rel_head(subj_g, obj_g, vr_eff, fb, prep["rel_w"], prep["rel_b"])
    rel_dists = rel_pad[:, :NR]

    # eval-mode outputs (filter_dets inputs)
    obj_probs = jax.nn.softmax(obj_dists2, axis=1)
    obj_scores = jnp.take_along_axis(obj_probs, obj_preds[:, None], axis=1)[:, 0]
    rel_rep = jax.nn.softmax(rel_dists, axis=1)
    return obj_dists2, obj_preds, obj_scores, rel_inds[:, 1:], rel_rep, rel_dists


# ------------------------------------------------------ pure-JAX reference --
def reference_forward(prep, obj_fmap, obj_logits, boxes, rel_inds, vr, *, C, P, NR):
    f32 = jnp.float32

    def mmb(x, w):   # mirrors the kernel's bf16-operand / f32-accumulate dots
        return jnp.dot(x.astype(jnp.bfloat16), w, preferred_element_type=f32)

    p = jax.nn.softmax(obj_logits, axis=1)
    obj_embed = mmb(p, prep["embed"])
    pos = jax.nn.relu(mmb(center_size(boxes), prep["pos_w"]) + prep["pos_b"])
    obj_ctx = (mmb(obj_fmap, prep["ocw_f"]) + mmb(obj_embed, prep["ocw_e"])
               + mmb(pos, prep["ocw_p"]) + prep["oc_b"])
    dists2 = (obj_fmap @ prep["dw_f"] + obj_embed @ prep["dw_e"]
              + pos @ prep["dw_p"] + obj_ctx @ prep["dw_c"] + prep["dec_b"])
    preds = jnp.argmax(dists2[:, 1:], axis=1) + 1
    e2 = prep["embed"][preds].astype(f32)
    edge_ctx = (mmb(e2, prep["ew_e2"]) + mmb(obj_fmap, prep["ew_f"])
                + mmb(obj_ctx, prep["ew_c"]) + prep["edge_b"])
    er = (mmb(edge_ctx, prep["post_w"]) + prep["post_b"]).reshape(-1, 2, P)
    s = er[:, 0][rel_inds[:, 1]]
    o = er[:, 1][rel_inds[:, 2]]
    prod = s * o
    lv = P // 2
    prod = jnp.concatenate([prod[:, :lv] * vr[:, :lv], prod[:, lv:]], axis=1)
    prod = jnp.tanh(prod)
    fb = prep["freq_bias"][preds[rel_inds[:, 1]] * C + preds[rel_inds[:, 2]], :NR]
    rel = mmb(prod, prep["rel_w"])[:, :NR] + prep["rel_b"][0, :NR] + fb
    return dists2, preds, rel


# ----------------------------------------------------------------- main -----
if __name__ == "__main__":
    # small config (module defaults scaled down)
    C, NR = 16, 16                    # num_classes, num_rels
    E, H, P, OBJ = 32, 32, 128, 64    # embed_dim, hidden_dim, pooling_dim, obj_dim
    N_PER_IM, N_IM = 8, 2
    N = N_PER_IM * N_IM

    key = jax.random.PRNGKey(0)
    kp, k1, k2, k3, k4 = jax.random.split(key, 5)
    params = init_params(kp, C=C, NR=NR, E=E, H=H, P=P, OBJ=OBJ)
    prep = prepare_params(params, OBJ=OBJ, E=E, H=H, P=P, NR=NR, C=C)

    obj_fmap = jax.random.normal(k1, (N, OBJ), jnp.float32)
    obj_logits = jax.random.normal(k2, (N, C), jnp.float32)
    im_inds = np.repeat(np.arange(N_IM), N_PER_IM).astype(np.int32)

    x1y1 = jax.random.uniform(k3, (N, 2), jnp.float32, 0.0, 60.0)
    wh = jax.random.uniform(k4, (N, 2), jnp.float32, 4.0, 40.0)
    boxes = jnp.concatenate([x1y1, x1y1 + wh], axis=1)

    # get_rel_inds (eval, sgcls: all same-image pairs, no self-pairs)
    rel_list = [(int(im_inds[i]), i, j) for i in range(N) for j in range(N)
                if i != j and im_inds[i] == im_inds[j]]
    rel_inds = jnp.asarray(np.array(rel_list, dtype=np.int32))   # [R, 3]
    R = rel_inds.shape[0]

    # TODO(synk): visual_rep (union boxes + VGG roi_fmap) not translated;
    # the fused visual representation is provided as an input.
    vr = jax.random.normal(jax.random.PRNGKey(7), (R, P), jnp.float32)

    fwd = jax.jit(functools.partial(rel_model_forward, C=C, P=P, NR=NR))
    outs = jax.block_until_ready(fwd(prep, obj_fmap, obj_logits, boxes, rel_inds, vr))
    obj_dists2, obj_preds, obj_scores, pair_inds, rel_rep, rel_dists = outs

    ref_dists2, ref_preds, ref_rel = reference_forward(
        prep, obj_fmap, obj_logits, boxes, rel_inds, vr, C=C, P=P, NR=NR)

    np.testing.assert_array_equal(np.asarray(obj_preds), np.asarray(ref_preds))
    np.testing.assert_allclose(np.asarray(obj_dists2), np.asarray(ref_dists2),
                               rtol=1e-2, atol=1e-2)
    np.testing.assert_allclose(np.asarray(rel_dists), np.asarray(ref_rel),
                               rtol=2e-2, atol=2e-2)
    assert obj_dists2.shape == (N, C)
    assert obj_preds.shape == (N,)
    assert obj_scores.shape == (N,)
    assert rel_rep.shape == (R, NR)
    assert rel_dists.shape == (R, NR)
    print("KERNEL_OK")
</pallas_src>

<mosaic_0001>
module attributes {stable_mosaic.version = 11 : i64} {
  func.func @_object_path_kernel(%arg0: i32, %arg1: memref<8x64xf32, #tpu.memory_space<vmem>>, %arg2: memref<8x16xf32, #tpu.memory_space<vmem>>, %arg3: memref<8x4xf32, #tpu.memory_space<vmem>>, %arg4: memref<16x32xbf16, #tpu.memory_space<vmem>>, %arg5: memref<4x128xbf16, #tpu.memory_space<vmem>>, %arg6: memref<1x128xf32, #tpu.memory_space<vmem>>, %arg7: memref<64x32xbf16, #tpu.memory_space<vmem>>, %arg8: memref<32x32xbf16, #tpu.memory_space<vmem>>, %arg9: memref<128x32xbf16, #tpu.memory_space<vmem>>, %arg10: memref<1x32xf32, #tpu.memory_space<vmem>>, %arg11: memref<64x16xf32, #tpu.memory_space<vmem>>, %arg12: memref<32x16xf32, #tpu.memory_space<vmem>>, %arg13: memref<128x16xf32, #tpu.memory_space<vmem>>, %arg14: memref<32x16xf32, #tpu.memory_space<vmem>>, %arg15: memref<1x16xf32, #tpu.memory_space<vmem>>, %arg16: memref<32x32xbf16, #tpu.memory_space<vmem>>, %arg17: memref<64x32xbf16, #tpu.memory_space<vmem>>, %arg18: memref<32x32xbf16, #tpu.memory_space<vmem>>, %arg19: memref<1x32xf32, #tpu.memory_space<vmem>>, %arg20: memref<32x256xbf16, #tpu.memory_space<vmem>>, %arg21: memref<1x256xf32, #tpu.memory_space<vmem>>, %arg22: memref<8x16xf32, #tpu.memory_space<vmem>>, %arg23: memref<8x1xi32, #tpu.memory_space<vmem>>, %arg24: memref<8x256xf32, #tpu.memory_space<vmem>>) attributes {dimension_semantics = [#tpu.dimension_semantics<parallel>], iteration_bounds = array<i64: 2>, scalar_prefetch = 0 : i64, scratch_operands = 0 : i64, tpu.core_type = #tpu.core_type<tc>, window_params = [{transform_indices = @transform_0, window_bounds = array<i64: 8, 64>}, {transform_indices = @transform_1, window_bounds = array<i64: 8, 16>}, {transform_indices = @transform_2, window_bounds = array<i64: 8, 4>}, {pipeline_mode = #tpu.pipeline_mode<synchronous>, transform_indices = @transform_3, window_bounds = array<i64: 16, 32>}, {pipeline_mode = #tpu.pipeline_mode<synchronous>, transform_indices = @transform_4, window_bounds = array<i64: 4, 128>}, {pipeline_mode = #tpu.pipeline_mode<synchronous>, transform_indices = @transform_5, window_bounds = array<i64: 1, 128>}, {pipeline_mode = #tpu.pipeline_mode<synchronous>, transform_indices = @transform_6, window_bounds = array<i64: 64, 32>}, {pipeline_mode = #tpu.pipeline_mode<synchronous>, transform_indices = @transform_7, window_bounds = array<i64: 32, 32>}, {pipeline_mode = #tpu.pipeline_mode<synchronous>, transform_indices = @transform_8, window_bounds = array<i64: 128, 32>}, {pipeline_mode = #tpu.pipeline_mode<synchronous>, transform_indices = @transform_9, window_bounds = array<i64: 1, 32>}, {pipeline_mode = #tpu.pipeline_mode<synchronous>, transform_indices = @transform_10, window_bounds = array<i64: 64, 16>}, {pipeline_mode = #tpu.pipeline_mode<synchronous>, transform_indices = @transform_11, window_bounds = array<i64: 32, 16>}, {pipeline_mode = #tpu.pipeline_mode<synchronous>, transform_indices = @transform_12, window_bounds = array<i64: 128, 16>}, {pipeline_mode = #tpu.pipeline_mode<synchronous>, transform_indices = @transform_13, window_bounds = array<i64: 32, 16>}, {pipeline_mode = #tpu.pipeline_mode<synchronous>, transform_indices = @transform_14, window_bounds = array<i64: 1, 16>}, {pipeline_mode = #tpu.pipeline_mode<synchronous>, transform_indices = @transform_15, window_bounds = array<i64: 32, 32>}, {pipeline_mode = #tpu.pipeline_mode<synchronous>, transform_indices = @transform_16, window_bounds = array<i64: 64, 32>}, {pipeline_mode = #tpu.pipeline_mode<synchronous>, transform_indices = @transform_17, window_bounds = array<i64: 32, 32>}, {pipeline_mode = #tpu.pipeline_mode<synchronous>, transform_indices = @transform_18, window_bounds = array<i64: 1, 32>}, {pipeline_mode = #tpu.pipeline_mode<synchronous>, transform_indices = @transform_19, window_bounds = array<i64: 32, 256>}, {pipeline_mode = #tpu.pipeline_mode<synchronous>, transform_indices = @transform_20, window_bounds = array<i64: 1, 256>}, {transform_indices = @transform_21, window_bounds = array<i64: 8, 16>}, {transform_indices = @transform_22, window_bounds = array<i64: 8, 1>}, {transform_indices = @transform_23, window_bounds = array<i64: 8, 256>}]} {
    %c0 = arith.constant 0 : index
    %c0_0 = arith.constant 0 : index
    %0 = vector.load %arg1[%c0, %c0_0] : memref<8x64xf32, #tpu.memory_space<vmem>>, vector<8x64xf32>
    %c0_1 = arith.constant 0 : index
    %c0_2 = arith.constant 0 : index
    %1 = vector.load %arg2[%c0_1, %c0_2] : memref<8x16xf32, #tpu.memory_space<vmem>>, vector<8x16xf32>
    %cst = arith.constant dense<0xFF800000> : vector<8xf32>
    %2 = vector.multi_reduction <maximumf>, %1, %cst [1] : vector<8x16xf32> to vector<8xf32>
    %3 = vector.shape_cast %2 : vector<8xf32> to vector<8x1xf32>
    %4 = vector.broadcast %3 : vector<8x1xf32> to vector<8x16xf32>
    %5 = arith.subf %1, %4 : vector<8x16xf32>
    %6 = math.exp %5 : vector<8x16xf32>
    %cst_3 = arith.constant dense<0.000000e+00> : vector<8xf32>
    %7 = vector.multi_reduction <add>, %6, %cst_3 [1] : vector<8x16xf32> to vector<8xf32>
    %8 = vector.shape_cast %7 : vector<8xf32> to vector<8x1xf32>
    %9 = vector.broadcast %8 : vector<8x1xf32> to vector<8x16xf32>
    %10 = arith.divf %6, %9 : vector<8x16xf32>
    %c0_4 = arith.constant 0 : index
    %c0_5 = arith.constant 0 : index
    %11 = vector.load %arg4[%c0_4, %c0_5] : memref<16x32xbf16, #tpu.memory_space<vmem>>, vector<16x32xbf16>
    %12 = arith.truncf %10 : vector<8x16xf32> to vector<8x16xbf16>
    %cst_6 = arith.constant dense<0.000000e+00> : vector<8x32xf32>
    %13 = tpu.matmul %12, %11, %cst_6 {dimension_numbers = #tpu.dot_dimension_numbers<[1], [0], [0], [1], [0, 0, 1, 1], [], []>} : vector<8x16xbf16>, vector<16x32xbf16>, vector<8x32xf32> -> vector<8x32xf32>
    %c0_7 = arith.constant 0 : index
    %c0_8 = arith.constant 0 : index
    %14 = vector.load %arg3[%c0_7, %c0_8] : memref<8x4xf32, #tpu.memory_space<vmem>>, vector<8x4xf32>
    %15 = arith.truncf %14 : vector<8x4xf32> to vector<8x4xbf16>
    %c0_9 = arith.constant 0 : index
    %c0_10 = arith.constant 0 : index
    %16 = vector.load %arg5[%c0_9, %c0_10] : memref<4x128xbf16, #tpu.memory_space<vmem>>, vector<4x128xbf16>
    %cst_11 = arith.constant dense<0.000000e+00> : vector<8x128xf32>
    %17 = tpu.matmul %15, %16, %cst_11 {dimension_numbers = #tpu.dot_dimension_numbers<[1], [0], [0], [1], [0, 0, 1, 1], [], []>} : vector<8x4xbf16>, vector<4x128xbf16>, vector<8x128xf32> -> vector<8x128xf32>
    %c0_12 = arith.constant 0 : index
    %c0_13 = arith.constant 0 : index
    %18 = vector.load %arg6[%c0_12, %c0_13] : memref<1x128xf32, #tpu.memory_space<vmem>>, vector<1x128xf32>
    %19 = vector.broadcast %18 : vector<1x128xf32> to vector<8x128xf32>
    %20 = arith.addf %17, %19 : vector<8x128xf32>
    %cst_14 = arith.constant 0.000000e+00 : f32
    %21 = vector.broadcast %cst_14 : f32 to vector<8x128xf32>
    %22 = arith.maximumf %20, %21 : vector<8x128xf32>
    %23 = arith.truncf %0 : vector<8x64xf32> to vector<8x64xbf16>
    %24 = arith.truncf %13 : vector<8x32xf32> to vector<8x32xbf16>
    %25 = arith.truncf %22 : vector<8x128xf32> to vector<8x128xbf16>
    %c0_15 = arith.constant 0 : index
    %c0_16 = arith.constant 0 : index
    %26 = vector.load %arg7[%c0_15, %c0_16] : memref<64x32xbf16, #tpu.memory_space<vmem>>, vector<64x32xbf16>
    %cst_17 = arith.constant dense<0.000000e+00> : vector<8x32xf32>
    %27 = tpu.matmul %23, %26, %cst_17 {dimension_numbers = #tpu.dot_dimension_numbers<[1], [0], [0], [1], [0, 0, 1, 1], [], []>} : vector<8x64xbf16>, vector<64x32xbf16>, vector<8x32xf32> -> vector<8x32xf32>
    %c0_18 = arith.constant 0 : index
    %c0_19 = arith.constant 0 : index
    %28 = vector.load %arg8[%c0_18, %c0_19] : memref<32x32xbf16, #tpu.memory_space<vmem>>, vector<32x32xbf16>
    %cst_20 = arith.constant dense<0.000000e+00> : vector<8x32xf32>
    %29 = tpu.matmul %24, %28, %cst_20 {dimension_numbers = #tpu.dot_dimension_numbers<[1], [0], [0], [1], [0, 0, 1, 1], [], []>} : vector<8x32xbf16>, vector<32x32xbf16>, vector<8x32xf32> -> vector<8x32xf32>
    %30 = arith.addf %27, %29 : vector<8x32xf32>
    %c0_21 = arith.constant 0 : index
    %c0_22 = arith.constant 0 : index
    %31 = vector.load %arg9[%c0_21, %c0_22] : memref<128x32xbf16, #tpu.memory_space<vmem>>, vector<128x32xbf16>
    %cst_23 = arith.constant dense<0.000000e+00> : vector<8x32xf32>
    %32 = tpu.matmul %25, %31, %cst_23 {dimension_numbers = #tpu.dot_dimension_numbers<[1], [0], [0], [1], [0, 0, 1, 1], [], []>} : vector<8x128xbf16>, vector<128x32xbf16>, vector<8x32xf32> -> vector<8x32xf32>
    %33 = arith.addf %30, %32 : vector<8x32xf32>
    %c0_24 = arith.constant 0 : index
    %c0_25 = arith.constant 0 : index
    %34 = vector.load %arg10[%c0_24, %c0_25] : memref<1x32xf32, #tpu.memory_space<vmem>>, vector<1x32xf32>
    %35 = vector.broadcast %34 : vector<1x32xf32> to vector<8x32xf32>
    %36 = arith.addf %33, %35 : vector<8x32xf32>
    %c0_26 = arith.constant 0 : index
    %c0_27 = arith.constant 0 : index
    %37 = vector.load %arg11[%c0_26, %c0_27] : memref<64x16xf32, #tpu.memory_space<vmem>>, vector<64x16xf32>
    %cst_28 = arith.constant dense<0.000000e+00> : vector<8x16xf32>
    %38 = tpu.matmul %0, %37, %cst_28 {dimension_numbers = #tpu.dot_dimension_numbers<[1], [0], [0], [1], [0, 0, 1, 1], [], []>} : vector<8x64xf32>, vector<64x16xf32>, vector<8x16xf32> -> vector<8x16xf32>
    %c0_29 = arith.constant 0 : index
    %c0_30 = arith.constant 0 : index
    %39 = vector.load %arg12[%c0_29, %c0_30] : memref<32x16xf32, #tpu.memory_space<vmem>>, vector<32x16xf32>
    %cst_31 = arith.constant dense<0.000000e+00> : vector<8x16xf32>
    %40 = tpu.matmul %13, %39, %cst_31 {dimension_numbers = #tpu.dot_dimension_numbers<[1], [0], [0], [1], [0, 0, 1, 1], [], []>} : vector<8x32xf32>, vector<32x16xf32>, vector<8x16xf32> -> vector<8x16xf32>
    %41 = arith.addf %38, %40 : vector<8x16xf32>
    %c0_32 = arith.constant 0 : index
    %c0_33 = arith.constant 0 : index
    %42 = vector.load %arg13[%c0_32, %c0_33] : memref<128x16xf32, #tpu.memory_space<vmem>>, vector<128x16xf32>
    %cst_34 = arith.constant dense<0.000000e+00> : vector<8x16xf32>
    %43 = tpu.matmul %22, %42, %cst_34 {dimension_numbers = #tpu.dot_dimension_numbers<[1], [0], [0], [1], [0, 0, 1, 1], [], []>} : vector<8x128xf32>, vector<128x16xf32>, vector<8x16xf32> -> vector<8x16xf32>
    %44 = arith.addf %41, %43 : vector<8x16xf32>
    %c0_35 = arith.constant 0 : index
    %c0_36 = arith.constant 0 : index
    %45 = vector.load %arg14[%c0_35, %c0_36] : memref<32x16xf32, #tpu.memory_space<vmem>>, vector<32x16xf32>
    %cst_37 = arith.constant dense<0.000000e+00> : vector<8x16xf32>
    %46 = tpu.matmul %36, %45, %cst_37 {dimension_numbers = #tpu.dot_dimension_numbers<[1], [0], [0], [1], [0, 0, 1, 1], [], []>} : vector<8x32xf32>, vector<32x16xf32>, vector<8x16xf32> -> vector<8x16xf32>
    %47 = arith.addf %44, %46 : vector<8x16xf32>
    %c0_38 = arith.constant 0 : index
    %c0_39 = arith.constant 0 : index
    %48 = vector.load %arg15[%c0_38, %c0_39] : memref<1x16xf32, #tpu.memory_space<vmem>>, vector<1x16xf32>
    %49 = vector.broadcast %48 : vector<1x16xf32> to vector<8x16xf32>
    %50 = arith.addf %47, %49 : vector<8x16xf32>
    %c0_40 = arith.constant 0 : index
    %c0_41 = arith.constant 0 : index
    %51 = vector.load %arg22[%c0_40, %c0_41] : memref<8x16xf32, #tpu.memory_space<vmem>>, vector<8x16xf32>
    tpu.vector_store %arg22[%c0_40, %c0_41], %50 {strides = array<i32>} : memref<8x16xf32, #tpu.memory_space<vmem>>, vector<8x16xf32>,
    %52 = tpu.iota {dimensions = array<i32: 1>} : vector<8x16xi32>
    %c0_i32 = arith.constant 0 : i32
    %53 = vector.broadcast %c0_i32 : i32 to vector<8x16xi32>
    %54 = arith.cmpi eq, %52, %53 : vector<8x16xi32>
    %cst_42 = arith.constant 0xFF800000 : f32
    %55 = vector.broadcast %cst_42 : f32 to vector<8x16xf32>
    %56 = arith.select %54, %55, %50 : vector<8x16xi1>, vector<8x16xf32>
    %cst_43 = arith.constant dense<0xFF800000> : vector<8xf32>
    %57 = vector.multi_reduction <maximumf>, %56, %cst_43 [1] : vector<8x16xf32> to vector<8xf32>
    %58 = vector.shape_cast %57 : vector<8xf32> to vector<8x1xf32>
    %59 = vector.broadcast %58 : vector<8x1xf32> to vector<8x16xf32>
    %60 = arith.cmpf oeq, %56, %59 : vector<8x16xf32>
    %61 = arith.sitofp %52 : vector<8x16xi32> to vector<8x16xf32>
    %cst_44 = arith.constant 1.600000e+01 : f32
    %62 = vector.broadcast %cst_44 : f32 to vector<8x16xf32>
    %63 = arith.select %60, %61, %62 : vector<8x16xi1>, vector<8x16xf32>
    %cst_45 = arith.constant dense<0x7F800000> : vector<8xf32>
    %64 = vector.multi_reduction <minimumf>, %63, %cst_45 [1] : vector<8x16xf32> to vector<8xf32>
    %65 = vector.shape_cast %64 : vector<8xf32> to vector<8x1xf32>
    %66 = arith.fptosi %65 : vector<8x1xf32> to vector<8x1xi32>
    %c0_46 = arith.constant 0 : index
    %c0_47 = arith.constant 0 : index
    %67 = vector.load %arg23[%c0_46, %c0_47] : memref<8x1xi32, #tpu.memory_space<vmem>>, vector<8x1xi32>
    tpu.vector_store %arg23[%c0_46, %c0_47], %66 {strides = array<i32>} : memref<8x1xi32, #tpu.memory_space<vmem>>, vector<8x1xi32>,
    %68 = vector.broadcast %66 : vector<8x1xi32> to vector<8x16xi32>
    %69 = arith.cmpi eq, %52, %68 : vector<8x16xi32>
    %70 = arith.extui %69 : vector<8x16xi1> to vector<8x16xi32>
    %71 = arith.sitofp %70 : vector<8x16xi32> to vector<8x16xf32>
    %72 = arith.truncf %71 : vector<8x16xf32> to vector<8x16xbf16>
    %cst_48 = arith.constant dense<0.000000e+00> : vector<8x32xf32>
    %73 = tpu.matmul %72, %11, %cst_48 {dimension_numbers = #tpu.dot_dimension_numbers<[1], [0], [0], [1], [0, 0, 1, 1], [], []>} : vector<8x16xbf16>, vector<16x32xbf16>, vector<8x32xf32> -> vector<8x32xf32>
    %74 = arith.truncf %73 : vector<8x32xf32> to vector<8x32xbf16>
    %c0_49 = arith.constant 0 : index
    %c0_50 = arith.constant 0 : index
    %75 = vector.load %arg16[%c0_49, %c0_50] : memref<32x32xbf16, #tpu.memory_space<vmem>>, vector<32x32xbf16>
    %cst_51 = arith.constant dense<0.000000e+00> : vector<8x32xf32>
    %76 = tpu.matmul %74, %75, %cst_51 {dimension_numbers = #tpu.dot_dimension_numbers<[1], [0], [0], [1], [0, 0, 1, 1], [], []>} : vector<8x32xbf16>, vector<32x32xbf16>, vector<8x32xf32> -> vector<8x32xf32>
    %c0_52 = arith.constant 0 : index
    %c0_53 = arith.constant 0 : index
    %77 = vector.load %arg17[%c0_52, %c0_53] : memref<64x32xbf16, #tpu.memory_space<vmem>>, vector<64x32xbf16>
    %cst_54 = arith.constant dense<0.000000e+00> : vector<8x32xf32>
    %78 = tpu.matmul %23, %77, %cst_54 {dimension_numbers = #tpu.dot_dimension_numbers<[1], [0], [0], [1], [0, 0, 1, 1], [], []>} : vector<8x64xbf16>, vector<64x32xbf16>, vector<8x32xf32> -> vector<8x32xf32>
    %79 = arith.addf %76, %78 : vector<8x32xf32>
    %80 = arith.truncf %36 : vector<8x32xf32> to vector<8x32xbf16>
    %c0_55 = arith.constant 0 : index
    %c0_56 = arith.constant 0 : index
    %81 = vector.load %arg18[%c0_55, %c0_56] : memref<32x32xbf16, #tpu.memory_space<vmem>>, vector<32x32xbf16>
    %cst_57 = arith.constant dense<0.000000e+00> : vector<8x32xf32>
    %82 = tpu.matmul %80, %81, %cst_57 {dimension_numbers = #tpu.dot_dimension_numbers<[1], [0], [0], [1], [0, 0, 1, 1], [], []>} : vector<8x32xbf16>, vector<32x32xbf16>, vector<8x32xf32> -> vector<8x32xf32>
    %83 = arith.addf %79, %82 : vector<8x32xf32>
    %c0_58 = arith.constant 0 : index
    %c0_59 = arith.constant 0 : index
    %84 = vector.load %arg19[%c0_58, %c0_59] : memref<1x32xf32, #tpu.memory_space<vmem>>, vector<1x32xf32>
    %85 = vector.broadcast %84 : vector<1x32xf32> to vector<8x32xf32>
    %86 = arith.addf %83, %85 : vector<8x32xf32>
    %87 = arith.truncf %86 : vector<8x32xf32> to vector<8x32xbf16>
    %c0_60 = arith.constant 0 : index
    %c0_61 = arith.constant 0 : index
    %88 = vector.load %arg20[%c0_60, %c0_61] : memref<32x256xbf16, #tpu.memory_space<vmem>>, vector<32x256xbf16>
    %cst_62 = arith.constant dense<0.000000e+00> : vector<8x256xf32>
    %89 = tpu.matmul %87, %88, %cst_62 {dimension_numbers = #tpu.dot_dimension_numbers<[1], [0], [0], [1], [0, 0, 1, 1], [], []>} : vector<8x32xbf16>, vector<32x256xbf16>, vector<8x256xf32> -> vector<8x256xf32>
    %c0_63 = arith.constant 0 : index
    %c0_64 = arith.constant 0 : index
    %90 = vector.load %arg21[%c0_63, %c0_64] : memref<1x256xf32, #tpu.memory_space<vmem>>, vector<1x256xf32>
    %91 = vector.broadcast %90 : vector<1x256xf32> to vector<8x256xf32>
    %92 = arith.addf %89, %91 : vector<8x256xf32>
    %c0_65 = arith.constant 0 : index
    %c0_66 = arith.constant 0 : index
    %93 = vector.load %arg24[%c0_65, %c0_66] : memref<8x256xf32, #tpu.memory_space<vmem>>, vector<8x256xf32>
    tpu.vector_store %arg24[%c0_65, %c0_66], %92 {strides = array<i32>} : memref<8x256xf32, #tpu.memory_space<vmem>>, vector<8x256xf32>,
    return
  }
  func.func @transform_0(%arg0: i32) -> (i32, i32) {
    %c0_i32 = arith.constant 0 : i32
    %c0_i32_0 = arith.constant 0 : i32
    return %arg0, %c0_i32 : i32, i32
  }
  func.func @transform_1(%arg0: i32) -> (i32, i32) {
    %c0_i32 = arith.constant 0 : i32
    %c0_i32_0 = arith.constant 0 : i32
    return %arg0, %c0_i32 : i32, i32
  }
  func.func @transform_2(%arg0: i32) -> (i32, i32) {
    %c0_i32 = arith.constant 0 : i32
    %c0_i32_0 = arith.constant 0 : i32
    return %arg0, %c0_i32 : i32, i32
  }
  func.func @transform_3(%arg0: i32) -> (i32, i32) {
    %c0_i32 = arith.constant 0 : i32
    %c0_i32_0 = arith.constant 0 : i32
    %c0_i32_1 = arith.constant 0 : i32
    return %c0_i32, %c0_i32_0 : i32, i32
  }
  func.func @transform_4(%arg0: i32) -> (i32, i32) {
    %c0_i32 = arith.constant 0 : i32
    %c0_i32_0 = arith.constant 0 : i32
    %c0_i32_1 = arith.constant 0 : i32
    return %c0_i32, %c0_i32_0 : i32, i32
  }
  func.func @transform_5(%arg0: i32) -> (i32, i32) {
    %c0_i32 = arith.constant 0 : i32
    %c0_i32_0 = arith.constant 0 : i32
    %c0_i32_1 = arith.constant 0 : i32
    return %c0_i32, %c0_i32_0 : i32, i32
  }
  func.func @transform_6(%arg0: i32) -> (i32, i32) {
    %c0_i32 = arith.constant 0 : i32
    %c0_i32_0 = arith.constant 0 : i32
    %c0_i32_1 = arith.constant 0 : i32
    return %c0_i32, %c0_i32_0 : i32, i32
  }
  func.func @transform_7(%arg0: i32) -> (i32, i32) {
    %c0_i32 = arith.constant 0 : i32
    %c0_i32_0 = arith.constant 0 : i32
    %c0_i32_1 = arith.constant 0 : i32
    return %c0_i32, %c0_i32_0 : i32, i32
  }
  func.func @transform_8(%arg0: i32) -> (i32, i32) {
    %c0_i32 = arith.constant 0 : i32
    %c0_i32_0 = arith.constant 0 : i32
    %c0_i32_1 = arith.constant 0 : i32
    return %c0_i32, %c0_i32_0 : i32, i32
  }
  func.func @transform_9(%arg0: i32) -> (i32, i32) {
    %c0_i32 = arith.constant 0 : i32
    %c0_i32_0 = arith.constant 0 : i32
    %c0_i32_1 = arith.constant 0 : i32
    return %c0_i32, %c0_i32_0 : i32, i32
  }
  func.func @transform_10(%arg0: i32) -> (i32, i32) {
    %c0_i32 = arith.constant 0 : i32
    %c0_i32_0 = arith.constant 0 : i32
    %c0_i32_1 = arith.constant 0 : i32
    return %c0_i32, %c0_i32_0 : i32, i32
  }
  func.func @transform_11(%arg0: i32) -> (i32, i32) {
    %c0_i32 = arith.constant 0 : i32
    %c0_i32_0 = arith.constant 0 : i32
    %c0_i32_1 = arith.constant 0 : i32
    return %c0_i32, %c0_i32_0 : i32, i32
  }
  func.func @transform_12(%arg0: i32) -> (i32, i32) {
    %c0_i32 = arith.constant 0 : i32
    %c0_i32_0 = arith.constant 0 : i32
    %c0_i32_1 = arith.constant 0 : i32
    return %c0_i32, %c0_i32_0 : i32, i32
  }
  func.func @transform_13(%arg0: i32) -> (i32, i32) {
    %c0_i32 = arith.constant 0 : i32
    %c0_i32_0 = arith.constant 0 : i32
    %c0_i32_1 = arith.constant 0 : i32
    return %c0_i32, %c0_i32_0 : i32, i32
  }
  func.func @transform_14(%arg0: i32) -> (i32, i32) {
    %c0_i32 = arith.constant 0 : i32
    %c0_i32_0 = arith.constant 0 : i32
    %c0_i32_1 = arith.constant 0 : i32
    return %c0_i32, %c0_i32_0 : i32, i32
  }
  func.func @transform_15(%arg0: i32) -> (i32, i32) {
    %c0_i32 = arith.constant 0 : i32
    %c0_i32_0 = arith.constant 0 : i32
    %c0_i32_1 = arith.constant 0 : i32
    return %c0_i32, %c0_i32_0 : i32, i32
  }
  func.func @transform_16(%arg0: i32) -> (i32, i32) {
    %c0_i32 = arith.constant 0 : i32
    %c0_i32_0 = arith.constant 0 : i32
    %c0_i32_1 = arith.constant 0 : i32
    return %c0_i32, %c0_i32_0 : i32, i32
  }
  func.func @transform_17(%arg0: i32) -> (i32, i32) {
    %c0_i32 = arith.constant 0 : i32
    %c0_i32_0 = arith.constant 0 : i32
    %c0_i32_1 = arith.constant 0 : i32
    return %c0_i32, %c0_i32_0 : i32, i32
  }
  func.func @transform_18(%arg0: i32) -> (i32, i32) {
    %c0_i32 = arith.constant 0 : i32
    %c0_i32_0 = arith.constant 0 : i32
    %c0_i32_1 = arith.constant 0 : i32
    return %c0_i32, %c0_i32_0 : i32, i32
  }
  func.func @transform_19(%arg0: i32) -> (i32, i32) {
    %c0_i32 = arith.constant 0 : i32
    %c0_i32_0 = arith.constant 0 : i32
    %c0_i32_1 = arith.constant 0 : i32
    return %c0_i32, %c0_i32_0 : i32, i32
  }
  func.func @transform_20(%arg0: i32) -> (i32, i32) {
    %c0_i32 = arith.constant 0 : i32
    %c0_i32_0 = arith.constant 0 : i32
    %c0_i32_1 = arith.constant 0 : i32
    return %c0_i32, %c0_i32_0 : i32, i32
  }
  func.func @transform_21(%arg0: i32) -> (i32, i32) {
    %c0_i32 = arith.constant 0 : i32
    %c0_i32_0 = arith.constant 0 : i32
    return %arg0, %c0_i32 : i32, i32
  }
  func.func @transform_22(%arg0: i32) -> (i32, i32) {
    %c0_i32 = arith.constant 0 : i32
    %c0_i32_0 = arith.constant 0 : i32
    return %arg0, %c0_i32 : i32, i32
  }
  func.func @transform_23(%arg0: i32) -> (i32, i32) {
    %c0_i32 = arith.constant 0 : i32
    %c0_i32_0 = arith.constant 0 : i32
    return %arg0, %c0_i32 : i32, i32
  }
}

module attributes {stable_mosaic.version = 11 : i64} {
  func.func @_rel_kernel(%arg0: i32, %arg1: memref<16x128xf32, #tpu.memory_space<vmem>>, %arg2: memref<16x128xf32, #tpu.memory_space<vmem>>, %arg3: memref<16x128xf32, #tpu.memory_space<vmem>>, %arg4: memref<16x128xf32, #tpu.memory_space<vmem>>, %arg5: memref<128x128xbf16, #tpu.memory_space<vmem>>, %arg6: memref<1x128xf32, #tpu.memory_space<vmem>>, %arg7: memref<16x128xf32, #tpu.memory_space<vmem>>) attributes {dimension_semantics = [#tpu.dimension_semantics<parallel>], iteration_bounds = array<i64: 7>, scalar_prefetch = 0 : i64, scratch_operands = 0 : i64, tpu.core_type = #tpu.core_type<tc>, window_params = [{transform_indices = @transform_0, window_bounds = array<i64: 16, 128>}, {transform_indices = @transform_1, window_bounds = array<i64: 16, 128>}, {transform_indices = @transform_2, window_bounds = array<i64: 16, 128>}, {transform_indices = @transform_3, window_bounds = array<i64: 16, 128>}, {pipeline_mode = #tpu.pipeline_mode<synchronous>, transform_indices = @transform_4, window_bounds = array<i64: 128, 128>}, {pipeline_mode = #tpu.pipeline_mode<synchronous>, transform_indices = @transform_5, window_bounds = array<i64: 1, 128>}, {transform_indices = @transform_6, window_bounds = array<i64: 16, 128>}]} {
    %c0 = arith.constant 0 : index
    %c0_0 = arith.constant 0 : index
    %0 = vector.load %arg1[%c0, %c0_0] : memref<16x128xf32, #tpu.memory_space<vmem>>, vector<16x128xf32>
    %c0_1 = arith.constant 0 : index
    %c0_2 = arith.constant 0 : index
    %1 = vector.load %arg2[%c0_1, %c0_2] : memref<16x128xf32, #tpu.memory_space<vmem>>, vector<16x128xf32>
    %2 = arith.mulf %0, %1 : vector<16x128xf32>
    %c0_3 = arith.constant 0 : index
    %c0_4 = arith.constant 0 : index
    %3 = vector.load %arg3[%c0_3, %c0_4] : memref<16x128xf32, #tpu.memory_space<vmem>>, vector<16x128xf32>
    %4 = arith.mulf %2, %3 : vector<16x128xf32>
    %5 = math.tanh %4 : vector<16x128xf32>
    %6 = arith.truncf %5 : vector<16x128xf32> to vector<16x128xbf16>
    %c0_5 = arith.constant 0 : index
    %c0_6 = arith.constant 0 : index
    %7 = vector.load %arg5[%c0_5, %c0_6] : memref<128x128xbf16, #tpu.memory_space<vmem>>, vector<128x128xbf16>
    %cst = arith.constant dense<0.000000e+00> : vector<16x128xf32>
    %8 = tpu.matmul %6, %7, %cst {dimension_numbers = #tpu.dot_dimension_numbers<[1], [0], [0], [1], [0, 0, 1, 1], [], []>} : vector<16x128xbf16>, vector<128x128xbf16>, vector<16x128xf32> -> vector<16x128xf32>
    %c0_7 = arith.constant 0 : index
    %c0_8 = arith.constant 0 : index
    %9 = vector.load %arg6[%c0_7, %c0_8] : memref<1x128xf32, #tpu.memory_space<vmem>>, vector<1x128xf32>
    %10 = vector.broadcast %9 : vector<1x128xf32> to vector<16x128xf32>
    %11 = arith.addf %8, %10 : vector<16x128xf32>
    %c0_9 = arith.constant 0 : index
    %c0_10 = arith.constant 0 : index
    %12 = vector.load %arg4[%c0_9, %c0_10] : memref<16x128xf32, #tpu.memory_space<vmem>>, vector<16x128xf32>
    %13 = arith.addf %11, %12 : vector<16x128xf32>
    %c0_11 = arith.constant 0 : index
    %c0_12 = arith.constant 0 : index
    %14 = vector.load %arg7[%c0_11, %c0_12] : memref<16x128xf32, #tpu.memory_space<vmem>>, vector<16x128xf32>
    tpu.vector_store %arg7[%c0_11, %c0_12], %13 {strides = array<i32>} : memref<16x128xf32, #tpu.memory_space<vmem>>, vector<16x128xf32>,
    return
  }
  func.func @transform_0(%arg0: i32) -> (i32, i32) {
    %c0_i32 = arith.constant 0 : i32
    %c0_i32_0 = arith.constant 0 : i32
    return %arg0, %c0_i32 : i32, i32
  }
  func.func @transform_1(%arg0: i32) -> (i32, i32) {
    %c0_i32 = arith.constant 0 : i32
    %c0_i32_0 = arith.constant 0 : i32
    return %arg0, %c0_i32 : i32, i32
  }
  func.func @transform_2(%arg0: i32) -> (i32, i32) {
    %c0_i32 = arith.constant 0 : i32
    %c0_i32_0 = arith.constant 0 : i32
    return %arg0, %c0_i32 : i32, i32
  }
  func.func @transform_3(%arg0: i32) -> (i32, i32) {
    %c0_i32 = arith.constant 0 : i32
    %c0_i32_0 = arith.constant 0 : i32
    return %arg0, %c0_i32 : i32, i32
  }
  func.func @transform_4(%arg0: i32) -> (i32, i32) {
    %c0_i32 = arith.constant 0 : i32
    %c0_i32_0 = arith.constant 0 : i32
    %c0_i32_1 = arith.constant 0 : i32
    return %c0_i32, %c0_i32_0 : i32, i32
  }
  func.func @transform_5(%arg0: i32) -> (i32, i32) {
    %c0_i32 = arith.constant 0 : i32
    %c0_i32_0 = arith.constant 0 : i32
    %c0_i32_1 = arith.constant 0 : i32
    return %c0_i32, %c0_i32_0 : i32, i32
  }
  func.func @transform_6(%arg0: i32) -> (i32, i32) {
    %c0_i32 = arith.constant 0 : i32
    %c0_i32_0 = arith.constant 0 : i32
    return %arg0, %c0_i32 : i32, i32
  }
}

</mosaic_0001>

<bundles_post_ra>
// kernel: rel_model_forward.3
= control target key start
LH: loop header
LB: loop body
LE: loop exit
PB: predicated region body
PF: predicated region fallthrough
CT: control target
= control target key end

     0   :  { %s667_s21 = smov 0   ;;  %s727_s0 = inlined_call_operand.vmem [shape: f32[112,128], index: 0, kind: input, shape index: {}]   ;;  %s728_s1 = inlined_call_operand.vmem [shape: f32[112,128], index: 1, kind: input, shape index: {}]   ;;  %s729_s2 = inlined_call_operand.vmem [shape: f32[112,128], index: 2, kind: input, shape index: {}]   ;;  %s730_s3 = inlined_call_operand.vmem [shape: f32[112,128], index: 3, kind: input, shape index: {}]   ;;  %s731_s4 = inlined_call_operand.vmem [shape: bf16[128,128], index: 4, kind: input, shape index: {}]   ;;  %s732_s5 = inlined_call_operand.vmem [shape: f32[1,128], index: 5, kind: input, shape index: {}]   ;;  %s733_s6 = inlined_call_operand.vmem [shape: f32[112,128], index: 6, kind: output, shape index: {}]  }
   0x1 LB: > { %s545_s22 = sadd.s32 4294967295, %s628_s21   ;;  %p549_p0 = scmp.ge.s32.totalorder %s628_s21, 1  ;;  %s628_s21 = sphi %s667_s21, %s16_s21  }
   0x2   : > { %p246_p1 = scmp.lt.s32.totalorder %s628_s21, 8 }
   0x4   : > { %p247_p2 = pnand %p549_p0, %p246_p1 }
   0x5   : > { %v610_v0 = vld [vmem:[%s731_s4] sm:$0xff] (!%p247_p2)   ;;  %v630_v1 = vmov (!%p247_p2), 0.0   ;;  %v611_v2 = vld [vmem:[%s731_s4 + $0x8] sm:$0xff] (!%p247_p2)   ;;  %vm631_vm0 = vmmov (!%p247_p2), 0   ;;  %s550_s27 = sshll.u32 (!%p247_p2), %s545_s22, 1  ;;  %v612_v3 = vld [vmem:[%s731_s4 + $0x10] sm:$0xff] (!%p247_p2)  }
   0x6   : > { %250 = sbr.rel (%p247_p2) target bundleno = 257 (0x101), region = 44  ;;  %580 = vmatprep.subr.bf16.mxu0 (!%p247_p2), %v630_v1  ;;  %596 = vmatprep.mubr.msk.bf16.mxu0 (!%p247_p2), %vm631_vm0, %v630_v1  ;;  %p292_p3 = scmp.lt.s32.totalorder (!%p247_p2), %s550_s27, 13  ;;  %v613_v4 = vld [vmem:[%s731_s4 + $0x18] sm:$0xff] (!%p247_p2)   ;;  %v614_v15 = vld [vmem:[%s731_s4 + $0x20] sm:$0xff] (!%p247_p2)   ;;  %v615_v16 = vld [vmem:[%s731_s4 + $0x28] sm:$0xff] (!%p247_p2)  }
   0x7   : > { %581 = vmatpush3.bf16.msra.mxu0 (!%p247_p2), %v610_v0  ;;  %v616_v17 = vld [vmem:[%s731_s4 + $0x30] sm:$0xff] (!%p247_p2)   ;;  %v617_v20 = vld [vmem:[%s731_s4 + $0x38] sm:$0xff] (!%p247_p2)   ;;  %v560_v22 = vld [vmem:[%s732_s5] ss:$0 sm:$0xff] (!%p247_p2) }
   0x8   : > { %582 = vmatprep.subr.bf16.mxu0 (!%p247_p2), %v630_v1 }
   0xb   : > { %583 = vmatpush3.bf16.msra.mxu0 (!%p247_p2), %v611_v2 }
   0xc   : > { %584 = vmatprep.subr.bf16.mxu0 (!%p247_p2), %v630_v1 }
   0xd   : > { %s735_s27 = smov (!%p292_p3, %s550_s27), 13 }
   0xe   : > { %s684_s30 = sshll.u32 %s735_s27, 3 }
   0xf   : > { %s295_s11 = scalar_lea.vmem %s727_s0, %s684_s30  ;;  %s301_s14 = scalar_lea.vmem %s728_s1, %s684_s30  ;;  %585 = vmatpush3.bf16.msra.mxu0 %v612_v3 }
  0x10   : > { %s307_s17 = scalar_lea.vmem %s729_s2, %s684_s30  ;;  %v322_v5 = vld [vmem:[%s295_s11] sm:$0xff]  ;;  %v323_v6 = vld [vmem:[%s295_s11 + $0x8] sm:$0xff]  ;;  %586 = vmatprep.subr.bf16.mxu0 %v630_v1  ;;  %s313_s29 = scalar_lea.vmem %s730_s3, %s684_s30 }
  0x11   : > { %v324_v7 = vld [vmem:[%s301_s14] sm:$0xff]  ;;  %v325_v8 = vld [vmem:[%s301_s14 + $0x8] sm:$0xff]  ;;  %s319_s11 = scalar_lea.vmem %s733_s6, %s684_s30 }
  0x12   : > { %v326_v9 = vmul.f32 %v324_v7, %v322_v5  ;;  %v328_v10 = vld [vmem:[%s307_s17] sm:$0xff]  ;;  %v329_v11 = vld [vmem:[%s307_s17 + $0x8] sm:$0xff]  ;;  %v327_v12 = vmul.f32 %v325_v8, %v323_v6 }
  0x13   : > { %587 = vmatpush3.bf16.msra.mxu0 %v613_v4  ;;  %v447_v24 = vld [vmem:[%s313_s29] sm:$0xff]  ;;  %v448_v28 = vld [vmem:[%s313_s29 + $0x8] sm:$0xff] }
  0x14   : > { %v330_v13 = vmul.f32 %v328_v10, %v326_v9  ;;  %v331_v14 = vmul.f32 %v329_v11, %v327_v12  ;;  %588 = vmatprep.subr.bf16.mxu0 %v630_v1 }
  0x16   : > { %618 = vtanh.f32 %v330_v13 }
  0x17   : > { %620 = vtanh.f32 %v331_v14  ;;  %589 = vmatpush3.bf16.msra.mxu0 %v614_v15 }
  0x18   : > { %590 = vmatprep.subr.bf16.mxu0 %v630_v1 }
  0x1b   : > { %591 = vmatpush3.bf16.msra.mxu0 %v615_v16 }
  0x1c   : > { %592 = vmatprep.subr.bf16.mxu0 %v630_v1 }
  0x1f   : > { %593 = vmatpush3.bf16.msra.mxu0 %v616_v17 }
  0x20   : > { %v619_v18 = vpop.eup %618  ;;  %594 = vmatprep.subr.bf16.mxu0 %v630_v1 }
  0x21   : > { %v621_v19 = vpop.eup %620 }
  0x22   : > { %v334_v21 = vpack.c.bf16 %v621_v19, %v619_v18 }
  0x23   : > { %595 = vmatpush3.bf16.msra.mxu0 %v617_v20 }
  0x26   : > { %597 = vmatmul.mubr.bf16.vlgmr.msra.gmra.mrb[0].mxu0 %v334_v21 }
  0xf9   : > { %v440_v23 = vpop.f32.mrb[0].mxu0 }
  0xfa   : > { %v441_v25 = vadd.f32 %v560_v22, %v440_v23  ;;  %v598_v26 = vpop.f32.mrb[1].mxu0 }
  0xfb   : > { %v443_v27 = vpop.f32.mrb[2].mxu0 }
  0xfc   : > { %v449_v29 = vadd.f32 %v447_v24, %v441_v25  ;;  %v444_v30 = vadd.f32 %v560_v22, %v443_v27  ;;  %v599_v31 = vpop.f32.mrb[3].mxu0 }
  0xfe   : > { %451 = vst [vmem:[%s319_s11] sm:$0xff] %v449_v29  ;;  %v450_v32 = vadd.f32 %v448_v28, %v444_v30 }
 0x100   : > { %452 = vst [vmem:[%s319_s11 + $0x8] sm:$0xff] %v450_v32 }
 0x101 PF: > { %s16_s21 = sadd.s32 1, %s628_s21  }
 0x102   : > { %p13_p4 = scmp.ge.s32.totalorder %s16_s21, 9  }
 0x104   :  { %15 = sbr.rel (!%p13_p4) target bundleno = 1 (0x1), region = 83 }

// kernel: rel_model_forward.2
= control target key start
LH: loop header
LB: loop body
LE: loop exit
PB: predicated region body
PF: predicated region fallthrough
CT: control target
= control target key end

     0   :  { %s2819_s0 = inlined_call_operand.vmem [shape: f32[16,64], index: 0, kind: input, shape index: {}]   ;;  %s2820_s1 = inlined_call_operand.vmem [shape: f32[16,16], index: 1, kind: input, shape index: {}]   ;;  %s2821_s2 = inlined_call_operand.vmem [shape: f32[16,4], index: 2, kind: input, shape index: {}]   ;;  %s2822_s3 = inlined_call_operand.vmem [shape: bf16[16,32], index: 3, kind: input, shape index: {}]   ;;  %s2823_s4 = inlined_call_operand.vmem [shape: bf16[4,128], index: 4, kind: input, shape index: {}]   ;;  %s2824_s5 = inlined_call_operand.vmem [shape: f32[1,128], index: 5, kind: input, shape index: {}]   ;;  %s2825_s6 = inlined_call_operand.vmem [shape: bf16[64,32], index: 6, kind: input, shape index: {}]   ;;  %s2826_s7 = inlined_call_operand.vmem [shape: bf16[32,32], index: 7, kind: input, shape index: {}]   ;;  %s2827_s8 = inlined_call_operand.vmem [shape: bf16[128,32], index: 8, kind: input, shape index: {}]   ;;  %s2828_s9 = inlined_call_operand.vmem [shape: f32[1,32], index: 9, kind: input, shape index: {}]   ;;  %s2829_s10 = inlined_call_operand.vmem [shape: f32[64,16], index: 10, kind: input, shape index: {}]   ;;  %s2830_s11 = inlined_call_operand.vmem [shape: f32[32,16], index: 11, kind: input, shape index: {}]   ;;  %s2831_s12 = inlined_call_operand.vmem [shape: f32[128,16], index: 12, kind: input, shape index: {}]   ;;  %s2832_s13 = inlined_call_operand.vmem [shape: f32[32,16], index: 13, kind: input, shape index: {}]   ;;  %s2833_s14 = inlined_call_operand.vmem [shape: f32[1,16], index: 14, kind: input, shape index: {}]   ;;  %s2834_s15 = inlined_call_operand.vmem [shape: bf16[32,32], index: 15, kind: input, shape index: {}]   ;;  %s2835_s16 = inlined_call_operand.vmem [shape: bf16[64,32], index: 16, kind: input, shape index: {}]   ;;  %s2836_s17 = inlined_call_operand.vmem [shape: bf16[32,32], index: 17, kind: input, shape index: {}]   ;;  %s2837_s18 = inlined_call_operand.vmem [shape: f32[1,32], index: 18, kind: input, shape index: {}]   ;;  %s2838_s19 = inlined_call_operand.vmem [shape: bf16[32,256], index: 19, kind: input, shape index: {}]   ;;  %s2839_s20 = inlined_call_operand.vmem [shape: f32[1,256], index: 20, kind: input, shape index: {}]   ;;  %s2840_s21 = inlined_call_operand.vmem [shape: f32[16,16], index: 21, kind: output, shape index: {0}]   ;;  %s2841_s22 = inlined_call_operand.vmem [shape: s32[16,1], index: 22, kind: output, shape index: {1}]   ;;  %s2842_s23 = inlined_call_operand.vmem [shape: f32[16,256], index: 23, kind: output, shape index: {2}]  }
   0x1   :  { %2845 = sst [smem:[#allocation2_spill]] %s2819_s0 }
   0x2   :  { %2846 = sst [smem:[#allocation3_spill]] %s2820_s1 }
   0x3   :  { %2847 = sst [smem:[#allocation4_spill]] %s2821_s2 }
   0x4   :  { %2848 = sst [smem:[#allocation5_spill]] %s2822_s3 }
   0x5   :  { %2849 = sst [smem:[#allocation6_spill]] %s2823_s4  ;;  %s2479_s4 = smov 0  }
   0x6   :  { %2850 = sst [smem:[#allocation7_spill]] %s2824_s5 }
   0x7   :  { %2851 = sst [smem:[#allocation8_spill]] %s2825_s6 }
   0x8   :  { %2852 = sst [smem:[#allocation9_spill]] %s2826_s7 }
   0x9 LB: > { %s1961_s30 = sadd.s32 4294967295, %s2353_s4   ;;  %p1965_p0 = scmp.ge.s32.totalorder %s2353_s4, 1  ;;  %s2353_s4 = sphi %s2479_s4, %s34_s4  }
   0xa   : > { %p659_p1 = scmp.lt.s32.totalorder %s2353_s4, 3 }
   0xc   : > { %p660_p2 = pnand %p1965_p0, %p659_p1 }
   0xd   : > { %p738_p3 = scmp.lt.s32.totalorder (!%p660_p2), %s1961_s30, 1  ;;  %vm766_vm0 = vcmask (!%p660_p2), 130048   ;;  %s2853_s1 = sld [smem:[#allocation3_spill]] (!%p660_p2)  ;;  %v2355_v8 = vmov (!%p660_p2), 0.0   ;;  %vm2356_vm1 = vmmov (!%p660_p2), 0   ;;  %vm844_vm2 = vcmask (!%p660_p2), 1041408  }
   0xe   : > { %663 = sbr.rel (%p660_p2) target bundleno = 1966 (0x7ae), region = 104  ;;  %s2854_s27 = sld [smem:[#allocation5_spill]] (!%p660_p2)  ;;  %2090 = vmatprep.subr.bf16.mxu0 (!%p660_p2), %v2355_v8  ;;  %2092 = vmatprep.mubr.msk.bf16.mxu0 (!%p660_p2), %vm2356_vm1, %v2355_v8  ;;  %vm840_vm3 = vcmask (!%p660_p2), 31744   ;;  %v1149_v18 = vld [vmem:[%s2830_s11] sm:$0xff] (!%p660_p2)  ;;  %v1150_v19 = vld [vmem:[%s2830_s11 + $0x8] sm:$0xff] (!%p660_p2)  ;;  %vm984_vm4 = vcmask (!%p660_p2), 523264  }
   0xf   : > { %2096 = vmatprep.subr.bf16.mxu1 (!%p660_p2), %v2355_v8  ;;  %2098 = vmatprep.mubr.msk.bf16.mxu1 (!%p660_p2), %vm2356_vm1, %v2355_v8  ;;  %s2855_s29 = sld [smem:[#allocation6_spill]] (!%p660_p2)  ;;  %s2856_s25 = sld [smem:[#allocation4_spill]] (!%p660_p2)  ;;  %v2253_v21 = vpack.c.bf16 (!%p660_p2), %v1150_v19, %v1149_v18  ;;  %v2357_v22 = vmov (!%p660_p2), 0.0|0.0   ;;  %v1151_v23 = vld [vmem:[%s2830_s11 + $0x10] sm:$0xff] (!%p660_p2)  ;;  %v1152_v24 = vld [vmem:[%s2830_s11 + $0x18] sm:$0xff] (!%p660_p2)  ;;  %v1141_v40 = vld [vmem:[%s2829_s10] sm:$0xff] (!%p660_p2) }
  0x10   : > { %s2857_s2 = sld [smem:[#allocation8_spill]] (!%p660_p2)  ;;  %s2858_s0 = sld [smem:[#allocation2_spill]] (!%p660_p2)  ;;  %v2256_v25 = vpack.c.bf16 (!%p660_p2), %v1152_v24, %v1151_v23  ;;  %v1142_v41 = vld [vmem:[%s2829_s10 + $0x8] sm:$0xff] (!%p660_p2)  ;;  %vm916_vm5 = vcmask (!%p660_p2), 261120   ;;  %v1143_v43 = vld [vmem:[%s2829_s10 + $0x10] sm:$0xff] (!%p660_p2)  ;;  %v1144_v44 = vld [vmem:[%s2829_s10 + $0x18] sm:$0xff] (!%p660_p2) }
  0x11   : > { %v2259_v42 = vpack.c.bf16 (!%p660_p2), %v1142_v41, %v1141_v40  ;;  %v2321_v46 = vld [vmem:[%s2827_s8] sm:$0xff] (!%p660_p2)   ;;  %v2262_v50 = vpack.c.bf16 (!%p660_p2), %v1144_v44, %v1143_v43  ;;  %v1146_v53 = vld [vmem:[%s2829_s10 + $0x28] sm:$0xff] (!%p660_p2)  ;;  %v1147_v56 = vld [vmem:[%s2829_s10 + $0x30] sm:$0xff] (!%p660_p2)  ;;  %vm1487_vm8 = vcmask (!%p660_p2), 7168  }
  0x12   : > { %v1145_v52 = vld [vmem:[%s2829_s10 + $0x20] sm:$0xff] (!%p660_p2)  ;;  %v2322_v54 = vld [vmem:[%s2827_s8 + $0x8] sm:$0xff] (!%p660_p2)   ;;  %v1148_v57 = vld [vmem:[%s2829_s10 + $0x38] sm:$0xff] (!%p660_p2) }
  0x13   : > { %v2265_v55 = vpack.c.bf16 (!%p660_p2), %v1146_v53, %v1145_v52  ;;  %v2323_v58 = vld [vmem:[%s2827_s8 + $0x10] sm:$0xff] (!%p660_p2)   ;;  %v2268_v59 = vpack.c.bf16 (!%p660_p2), %v1148_v57, %v1147_v56  ;;  %v2324_v60 = vld [vmem:[%s2827_s8 + $0x18] sm:$0xff] (!%p660_p2)   ;;  %v2325_v61 = vld [vmem:[%s2827_s8 + $0x20] sm:$0xff] (!%p660_p2)  }
  0x14   : > { %v2501_v7 = vld [vmem:[%s2854_s27] sm:$0xff] (!%p660_p2)   ;;  %v2326_v62 = vld [vmem:[%s2827_s8 + $0x28] sm:$0xff] (!%p660_p2)   ;;  %s2860_s27 = sld [smem:[#allocation7_spill]] (!%p660_p2)  ;;  %v1309_v24 = vld [vmem:[%s2831_s12 + $0x50] sm:$0xff] (!%p660_p2) }
  0x15   : > { %s2862_s30 = smov (!%p738_p3, %s1961_s30), 1  ;;  %2091 = vmatpush3.bf16.msra.mxu0 %v2501_v7  ;;  %v832_v9 = vld [vmem:[%s2855_s29] sm:$0x3] }
  0x16   : > { %s2490_s24 = sshll.u32 %s2862_s30, 3  ;;  %2102 = vmatprep.subr.bf16.mxu0 %v2355_v8  ;;  %v846_v10 = vsel %vm844_vm2, %v832_v9, 0  ;;  %v2315_v13 = vld [vmem:[%s2857_s2] sm:$0xff]   ;;  %v2316_v14 = vld [vmem:[%s2857_s2 + $0x8] sm:$0xff]   ;;  %v2317_v15 = vld [vmem:[%s2857_s2 + $0x10] sm:$0xff]   ;;  %s2019_s7 = sshll.u32 %s2862_s30, 4 }
  0x17   : > { %s745_s26 = scalar_lea.vmem %s2853_s1, %s2490_s24  ;;  %s749_s5 = scalar_lea.vmem %s2856_s25, %s2490_s24  ;;  %2097 = vmatpush3.bf16.msra.mxu1 %v846_v10  ;;  %v2318_v16 = vld [vmem:[%s2857_s2 + $0x18] sm:$0xff]   ;;  %v1301_v10 = vld [vmem:[%s2831_s12 + $0x10] sm:$0xff]  ;;  %v1307_v19 = vld [vmem:[%s2831_s12 + $0x40] sm:$0xff] }
  0x18   : > { %v765_v0 = vld [vmem:[%s745_s26] sm:$0xff]  ;;  %2110 = vmatprep.subr.bf16.mxu1 %v2355_v8  ;;  %s741_s25 = scalar_lea.vmem %s2858_s0, %s2490_s24  ;;  %s2859_s1 = sld [smem:[#allocation9_spill]] }
  0x19   : > { %v767_v1 = vsel %vm766_vm0, %v765_v0, -inf  ;;  %v830_v11 = vld [vmem:[%s749_s5] sm:$0xff]  ;;  %s753_s0 = scalar_lea.vmem %s2840_s21, %s2490_s24  ;;  %s757_s26 = scalar_lea.vmem %s2841_s22, %s2490_s24 }
  0x1a   : > { %768 = vmax.xlane.f32.xlu0 %v767_v1  ;;  %v831_v12 = vpack.c.bf16 %v830_v11, %v830_v11  ;;  %v2539_v17 = vld [vmem:[%s741_s25] sm:$0xff]  ;;  %v2327_v1 = vld [vmem:[%s2827_s8 + $0x30] sm:$0xff]   ;;  %v1302_v11 = vld [vmem:[%s2831_s12 + $0x18] sm:$0xff]  ;;  %s762_s29 = scalar_lea.vmem %s2842_s23, %s2019_s7 }
  0x1b   : > { %v2550_v20 = vpack.c.bf16 %v2539_v17, %v2539_v17  ;;  %v1975_v63 = vld [vmem:[%s2860_s27] ss:$0 sm:$0xff] }
  0x1c   : > { %2099 = vmatmul.mubr.msk.bf16.vlgmr.msra.gmra.mrb[0].mxu1 %vm840_vm3, %v831_v12  ;;  %v2274_v12 = vpack.c.bf16 %v1302_v11, %v1301_v10  ;;  %v1993_v52 = vld [vmem:[%s2828_s9] ss:$0 sm:$0xff] }
  0x1d   : > { %2111 = vmatpush3.bf16.msra.mxu1 %v2315_v13  ;;  %2118 = vmatprep.mubr.msk.bf16.mxu1 %vm2356_vm1, %v2355_v8  ;;  %v1303_v13 = vld [vmem:[%s2831_s12 + $0x20] sm:$0xff] }
  0x1e   : > { %2112 = vmatprep.subr.bf16.mxu1 %v2355_v8  ;;  %v2319_v29 = vld [vmem:[%s2859_s1] sm:$0xff]   ;;  %v2320_v31 = vld [vmem:[%s2859_s1 + $0x8] sm:$0xff]  }
  0x21   : > { %2113 = vmatpush3.bf16.msra.mxu1 %v2316_v14  ;;  %v1304_v14 = vld [vmem:[%s2831_s12 + $0x28] sm:$0xff] }
  0x22   : > { %2114 = vmatprep.subr.bf16.mxu1 %v2355_v8 }
  0x25   : > { %2115 = vmatpush3.bf16.msra.mxu1 %v2317_v15  ;;  %v2277_v15 = vpack.c.bf16 %v1304_v14, %v1303_v13 }
  0x26   : > { %2116 = vmatprep.subr.bf16.mxu1 %v2355_v8 }
  0x29   : > { %2117 = vmatpush3.bf16.msra.mxu1 %v2318_v16  ;;  %v1305_v16 = vld [vmem:[%s2831_s12 + $0x30] sm:$0xff] }
  0x2a   : > { %2252 = vmatprep.subr.bf16.mxu1 %v2357_v22 }
  0x2c   : > { %2119 = vmatmul.mubr.msk.bf16.vlgmr.msra.gmra.mrb[4].mxu1 %vm984_vm4, %v2550_v20 }
  0x2d   : > { %2254 = vmatpush3.bf16.msra.mxu1 %v2253_v21  ;;  %2150 = vmatprep.mubr.msk.f32.mxu1 %vm2356_vm1, %v2355_v8  ;;  %v1308_v21 = vld [vmem:[%s2831_s12 + $0x48] sm:$0xff] }
  0x2e   : > { %2255 = vmatprep.subr.bf16.mxu1 %v2357_v22  ;;  %v2283_v23 = vpack.c.bf16 %v1308_v21, %v1307_v19  ;;  %v2331_v19 = vld [vmem:[%s2835_s16] sm:$0xff]  }
  0x31   : > { %2257 = vmatpush3.bf16.msra.mxu1 %v2256_v25  ;;  %v1310_v25 = vld [vmem:[%s2831_s12 + $0x58] sm:$0xff] }
  0x32   : > { %2258 = vmatprep.subr.bf16.mxu1 %v2357_v22 }
  0xa7   : > { %v769_v2 = vpop.xlane.xlu0 %768 }
  0xa8   : > { %v770_v3 = vsub.f32 %v765_v0, %v769_v2 }
  0xaa   : > { %v771_v4 = vmul.f32 1.442695, %v770_v3  ;;  %v2328_v3 = vld [vmem:[%s2827_s8 + $0x38] sm:$0xff]  }
  0xac   : > { %2343 = vpow2.f32 %v771_v4  ;;  %v1299_v4 = vld [vmem:[%s2831_s12] sm:$0xff] }
  0xb6   : > { %v2344_v5 = vpop.eup %2343 }
  0xb7   : > { %v773_v6 = vsel %vm766_vm0, %v2344_v5, 0.0 }
  0xb8   : > { %774 = vadd.xlane.f32.xlu0 %v773_v6 }
  0xef   : > { %v882_v32 = vpop.f32.mrb[0].mxu1 }
  0xf0   : > { %v2100_v33 = vpop.f32.mrb[1].mxu1  ;;  %v883_v0 = vadd.f32 %v1975_v63, %v882_v32 }
  0xf1   : > { %v885_v34 = vpop.f32.mrb[2].mxu1  ;;  %v1386_v33 = vld [vmem:[%s2832_s13] sm:$0xff] }
  0xf2   : > { %v2101_v35 = vpop.f32.mrb[3].mxu1  ;;  %v888_v2 = vmax.f32 %v883_v0, 0.0  ;;  %v1387_v34 = vld [vmem:[%s2832_s13 + $0x8] sm:$0xff]  ;;  %v1997_v0 = vld [vmem:[%s2833_s14] ss:$0 sm:$0xff] }
  0xf3   : > { %v2295_v35 = vpack.c.bf16 %v1387_v34, %v1386_v33 }
  0xf4   : > { %v891_v6 = vpack.c.bf16 %v888_v2, %v888_v2 }
  0xff   : > { %v2576_v36 = vpop.f32.mrb[4].mxu1 }
 0x100   : > { %v2120_v37 = vpop.f32.mrb[5].mxu1 }
 0x101   : > { %v1025_v38 = vpop.f32.mrb[6].mxu1  ;;  %v2329_v37 = vld [vmem:[%s2836_s17] sm:$0xff]  }
 0x102   : > { %v2121_v39 = vpop.f32.mrb[7].mxu1  ;;  %v1388_v38 = vld [vmem:[%s2832_s13 + $0x10] sm:$0xff] }
 0x103   : > { %v1389_v39 = vld [vmem:[%s2832_s13 + $0x18] sm:$0xff] }
 0x104   : > { %v2298_v40 = vpack.c.bf16 %v1389_v39, %v1388_v38  ;;  %v2342_v38 = vld [vmem:[%s2838_s19 + $0x14] ss:$8 sps:$4 sm:$0xff]   ;;  %v2340_v39 = vld [vmem:[%s2838_s19 + $0x10] ss:$8 sps:$4 sm:$0xff]  }
 0x145   : > { %v775_v26 = vpop.xlane.xlu0 %774 }
 0x146   : > { %2345 = vrcp.f32 %v775_v26  ;;  %v2286_v26 = vpack.c.bf16 %v1310_v25, %v1309_v24  ;;  %v2333_v24 = vld [vmem:[%s2835_s16 + $0x10] sm:$0xff]   ;;  %v2334_v25 = vld [vmem:[%s2835_s16 + $0x18] sm:$0xff]  }
 0x150   : > { %v2346_v27 = vpop.eup %2345 }
 0x151   : > { %v777_v28 = vmul.f32 %v2346_v27, %v2344_v5  ;;  %v1300_v5 = vld [vmem:[%s2831_s12 + $0x8] sm:$0xff]  ;;  %v1311_v27 = vld [vmem:[%s2831_s12 + $0x60] sm:$0xff] }
 0x152   : > { %v2271_v9 = vpack.c.bf16 %v1300_v5, %v1299_v4 }
 0x153   : > { %v780_v30 = vpack.c.bf16 %v777_v28, %v777_v28  ;;  %v1312_v28 = vld [vmem:[%s2831_s12 + $0x68] sm:$0xff] }
 0x155   : > { %2093 = vmatmul.mubr.msk.bf16.vlgmr.msra.gmra.mrb[0].mxu0 %vm766_vm0, %v780_v30  ;;  %v1313_v30 = vld [vmem:[%s2831_s12 + $0x70] sm:$0xff] }
 0x156   : > { %2103 = vmatpush3.bf16.msra.mxu0 %v2319_v29  ;;  %2106 = vmatprep.mubr.msk.bf16.mxu0 %vm2356_vm1, %v2355_v8  ;;  %v2289_v29 = vpack.c.bf16 %v1312_v28, %v1311_v27  ;;  %v2336_v27 = vld [vmem:[%s2834_s15 + $0x8] sm:$0xff]  }
 0x157   : > { %2104 = vmatprep.subr.bf16.mxu0 %v2355_v8 }
 0x15a   : > { %2105 = vmatpush3.bf16.msra.mxu0 %v2320_v31  ;;  %v1314_v31 = vld [vmem:[%s2831_s12 + $0x78] sm:$0xff] }
 0x15b   : > { %2122 = vmatprep.subr.bf16.mxu0 %v2355_v8  ;;  %v2292_v32 = vpack.c.bf16 %v1314_v31, %v1313_v30 }
 0x228   : > { %v824_v45 = vpop.f32.mrb[0].mxu0 }
 0x229   : > { %v890_v47 = vpack.c.bf16 %v824_v45, %v824_v45  ;;  %v2094_v48 = vpop.f32.mrb[1].mxu0  ;;  %2151 = vmatmul.mubr.msk.f32.vlgmr.msra.gmra.mrb[8].mxu1 %vm916_vm5, %v824_v45 }
 0x22a   : > { %2260 = vmatpush3.bf16.msra.mxu1 %v2259_v42  ;;  %v827_v49 = vpop.f32.mrb[2].mxu0  ;;  %2169 = vmatprep.mubr.msk.f32.mxu1 %vm2356_vm1, %v2355_v8 }
 0x22b   : > { %v2095_v51 = vpop.f32.mrb[3].mxu0  ;;  %2107 = vmatmul.mubr.msk.bf16.vlgmr.msra.gmra.mrb[4].mxu0 %vm916_vm5, %v890_v47  ;;  %2261 = vmatprep.subr.bf16.mxu1 %v2357_v22 }
 0x22c   : > { %2123 = vmatpush3.bf16.msra.mxu0 %v2321_v46  ;;  %2138 = vmatprep.mubr.msk.bf16.mxu0 %vm2356_vm1, %v2355_v8 }
 0x22d   : > { %2124 = vmatprep.subr.bf16.mxu0 %v2355_v8 }
 0x22e   : > { %2263 = vmatpush3.bf16.msra.mxu1 %v2262_v50 }
 0x22f   : > { %2264 = vmatprep.subr.bf16.mxu1 %v2357_v22 }
 0x230   : > { %2125 = vmatpush3.bf16.msra.mxu0 %v2322_v54 }
 0x231   : > { %2126 = vmatprep.subr.bf16.mxu0 %v2355_v8 }
 0x232   : > { %2266 = vmatpush3.bf16.msra.mxu1 %v2265_v55 }
 0x233   : > { %2267 = vmatprep.subr.bf16.mxu1 %v2357_v22 }
 0x234   : > { %2127 = vmatpush3.bf16.msra.mxu0 %v2323_v58 }
 0x235   : > { %2128 = vmatprep.subr.bf16.mxu0 %v2355_v8 }
 0x236   : > { %2269 = vmatpush3.bf16.msra.mxu1 %v2268_v59 }
 0x237   : > { %2294 = vmatprep.subr.bf16.mxu1 %v2357_v22 }
 0x238   : > { %2129 = vmatpush3.bf16.msra.mxu0 %v2324_v60 }
 0x239   : > { %2170 = vmatmul.mubr.msk.f32.vlgmr.msra.gmra.mrb[10].mxu1 %vm984_vm4, %v2539_v17  ;;  %2130 = vmatprep.subr.bf16.mxu0 %v2355_v8  ;;  %v1306_v17 = vld [vmem:[%s2831_s12 + $0x38] sm:$0xff] }
 0x23a   : > { %2215 = vmatprep.mubr.msk.f32.mxu1 %vm2356_vm1, %v2355_v8  ;;  %v2280_v18 = vpack.c.bf16 %v1306_v17, %v1305_v16  ;;  %2296 = vmatpush3.bf16.msra.mxu1 %v2295_v35 }
 0x23b   : > { %2297 = vmatprep.subr.bf16.mxu1 %v2357_v22 }
 0x23c   : > { %2131 = vmatpush3.bf16.msra.mxu0 %v2325_v61  ;;  %v1473_v61 = vlaneseq }
 0x23d   : > { %2132 = vmatprep.subr.bf16.mxu0 %v2355_v8 }
 0x23e   : > { %2299 = vmatpush3.bf16.msra.mxu1 %v2298_v40  ;;  %v2358_v40 = vmov 0  }
 0x23f   : > { %2218 = vmatprep.subr.bf16.mxu1 %v2355_v8 }
 0x240   : > { %2133 = vmatpush3.bf16.msra.mxu0 %v2326_v62  ;;  %v1474_v62 = vand.u32 127, %v1473_v61 }
 0x241   : > { %2134 = vmatprep.subr.bf16.mxu0 %v2355_v8 }
 0x242   : > { %vm1475_vm6 = vcmp.eq.s32.totalorder %v1474_v62, 0  ;;  %v1481_v11 = vcvt.s32.f32 %v1474_v62 }
 0x244   : > { %2135 = vmatpush3.bf16.msra.mxu0 %v2327_v1 }
 0x245   : > { %2136 = vmatprep.subr.bf16.mxu0 %v2355_v8 }
 0x248   : > { %2137 = vmatpush3.bf16.msra.mxu0 %v2328_v3 }
 0x249   : > { %2270 = vmatprep.subr.bf16.mxu0 %v2357_v22 }
 0x24b   : > { %2139 = vmatmul.mubr.bf16.vlgmr.msra.gmra.mrb[8].mxu0 %v891_v6 }
 0x24c   : > { %2272 = vmatpush3.bf16.msra.mxu0 %v2271_v9  ;;  %2204 = vmatprep.mubr.msk.f32.mxu0 %vm2356_vm1, %v2355_v8 }
 0x24d   : > { %2273 = vmatprep.subr.bf16.mxu0 %v2357_v22 }
 0x250   : > { %2275 = vmatpush3.bf16.msra.mxu0 %v2274_v12 }
 0x251   : > { %2276 = vmatprep.subr.bf16.mxu0 %v2357_v22 }
 0x254   : > { %2278 = vmatpush3.bf16.msra.mxu0 %v2277_v15 }
 0x255   : > { %2279 = vmatprep.subr.bf16.mxu0 %v2357_v22 }
 0x258   : > { %2281 = vmatpush3.bf16.msra.mxu0 %v2280_v18 }
 0x259   : > { %2282 = vmatprep.subr.bf16.mxu0 %v2357_v22 }
 0x25c   : > { %2284 = vmatpush3.bf16.msra.mxu0 %v2283_v23  ;;  %v2332_v23 = vld [vmem:[%s2835_s16 + $0x8] sm:$0xff]  }
 0x25d   : > { %2285 = vmatprep.subr.bf16.mxu0 %v2357_v22 }
 0x260   : > { %2287 = vmatpush3.bf16.msra.mxu0 %v2286_v26  ;;  %v2335_v26 = vld [vmem:[%s2834_s15] sm:$0xff]  }
 0x261   : > { %2288 = vmatprep.subr.bf16.mxu0 %v2357_v22 }
 0x264   : > { %2290 = vmatpush3.bf16.msra.mxu0 %v2289_v29 }
 0x265   : > { %2291 = vmatprep.subr.bf16.mxu0 %v2357_v22  ;;  %v2330_v22 = vld [vmem:[%s2836_s17 + $0x8] sm:$0xff]  }
 0x268   : > { %2293 = vmatpush3.bf16.msra.mxu0 %v2292_v32 }
 0x269   : > { %2244 = vmatprep.subr.bf16.mxu0 %v2355_v8 }
 0x26b   : > { %2205 = vmatmul.mubr.f32.vlgmr.msra.gmra.mrb[12].mxu0 %v888_v2 }
 0x26c   : > { %2248 = vmatprep.mubr.msk.bf16.mxu0 %vm2356_vm1, %v2355_v8  ;;  %2245 = vmatpush3.bf16.msra.mxu0 %v2329_v37  ;;  %v2339_v37 = vld [vmem:[%s2838_s19 + $0x4] ss:$8 sps:$4 sm:$0xff]  }
 0x26d   : > { %2246 = vmatprep.subr.bf16.mxu0 %v2355_v8 }
 0x270   : > { %2247 = vmatpush3.bf16.msra.mxu0 %v2330_v22 }
 0x2fc   : > { %v1222_v41 = vpop.f32.mrb[8].mxu1 }
 0x2fd   : > { %v2152_v42 = vpop.f32.mrb[9].mxu1 }
 0x2fe   : > { %v954_v43 = vpop.f32.mrb[4].mxu0 }
 0x2ff   : > { %v1023_v44 = vadd.f32 %v2576_v36, %v954_v43  ;;  %v2108_v45 = vpop.f32.mrb[5].mxu0  ;;  %v2011_v43 = vld [vmem:[%s2837_s18] ss:$0 sm:$0xff] }
 0x300   : > { %v957_v46 = vpop.f32.mrb[6].mxu0 }
 0x301   : > { %v2109_v47 = vpop.f32.mrb[7].mxu0 }
 0x30c   : > { %v1295_v48 = vpop.f32.mrb[10].mxu1 }
 0x30d   : > { %v1296_v49 = vadd.f32 %v1295_v48, %v1222_v41  ;;  %v2171_v50 = vpop.f32.mrb[11].mxu1 }
 0x31e   : > { %v1126_v51 = vpop.f32.mrb[8].mxu0 }
 0x31f   : > { %v1132_v53 = vadd.f32 %v1126_v51, %v1023_v44  ;;  %v2140_v54 = vpop.f32.mrb[9].mxu0  ;;  %v1742_v51 = vld [vmem:[%s2839_s20] sm:$0x3] }
 0x320   : > { %v1129_v55 = vpop.f32.mrb[10].mxu0 }
 0x321   : > { %v1140_v56 = vadd.f32 %v1993_v52, %v1132_v53  ;;  %v2141_v57 = vpop.f32.mrb[11].mxu0 }
 0x323   : > { %v1668_v58 = vpack.c.bf16 %v1140_v56, %v1140_v56  ;;  %2216 = vmatmul.mubr.msk.f32.vlgmr.msra.gmra.mrb[12].mxu1 %vm916_vm5, %v1140_v56 }
 0x324   : > { %2219 = vmatpush3.bf16.msra.mxu1 %v2501_v7  ;;  %2220 = vmatprep.mubr.msk.bf16.mxu1 %vm2356_vm1, %v2355_v8 }
 0x325   : > { %2249 = vmatmul.mubr.msk.bf16.vlgmr.msra.gmra.mrb[16].mxu0 %vm916_vm5, %v1668_v58  ;;  %2224 = vmatprep.subr.bf16.mxu1 %v2355_v8 }
 0x33e   : > { %v1381_v36 = vpop.f32.mrb[12].mxu0 }
 0x33f   : > { %v1385_v59 = vadd.f32 %v1381_v36, %v1296_v49  ;;  %v2206_v60 = vpop.f32.mrb[13].mxu0  ;;  %v1745_v49 = vshrl.u32 %v1473_v61, 7 }
 0x341   : > { %v1746_v50 = vsub.s32 0, %v1745_v49  ;;  %v1750_v52 = vsub.s32 1, %v1745_v49 }
 0x343   : > { %v1747_v53 = vrot.slane %v1742_v51, %v1746_v50  ;;  %v1751_v54 = vrot.slane %v1742_v51, %v1750_v52 }
 0x3f6   : > { %v1459_v63 = vpop.f32.mrb[12].mxu1 }
 0x3f7   : > { %v1463_v1 = vadd.f32 %v1459_v63, %v1385_v59  ;;  %v2217_v7 = vpop.f32.mrb[13].mxu1 }
 0x3f8   : > { %v2750_v2 = vpop.f32.mrb[16].mxu0 }
 0x3f9   : > { %v1471_v3 = vadd.f32 %v1997_v0, %v1463_v1  ;;  %v2250_v4 = vpop.f32.mrb[17].mxu0 }
 0x3fa   : > { %v1725_v5 = vpop.f32.mrb[18].mxu0 }
 0x3fb   : > { %1472 = vst.msk [vmem:[%s753_s0] sm:$0xff] %vm766_vm0, %v1471_v3  ;;  %v2251_v6 = vpop.f32.mrb[19].mxu0  ;;  %v1476_v9 = vsel %vm1475_vm6, -inf, %v1471_v3 }
 0x3fc   : > { %v1477_v10 = vsel %vm766_vm0, %v1476_v9, -inf }
 0x3fd   : > { %1478 = vmax.xlane.f32.xlu1 %v1477_v10 }
 0x48a   : > { %v1479_v12 = vpop.xlane.xlu1 %1478 }
 0x48b   : > { %vm1480_vm7 = vcmp.eq.f32.partialorder %v1476_v9, %v1479_v12 }
 0x48c   : > { %v1482_v13 = vsel %vm1480_vm7, %v1481_v11, 16.0 }
 0x48d   : > { %v1483_v14 = vsel %vm766_vm0, %v1482_v13, inf }
 0x48e   : > { %1484 = vmin.xlane.f32.xlu1 %v1483_v14 }
 0x51b   : > { %v1485_v15 = vpop.xlane.xlu1 %1484 }
 0x51c   : > { %v2300_v16 = vtrunc.f32 %v1485_v15 }
 0x51e   : > { %v2301_v17 = vcvt.f32.s32 %v2300_v16 }
 0x520   : > { %1488 = vst.msk [vmem:[%s757_s26] sm:$0xff] %vm1487_vm8, %v2301_v17  ;;  %vm1489_vm9 = vcmp.eq.s32.totalorder %v1474_v62, %v2301_v17 }
 0x521   : > { %v1998_v18 = vsel %vm1489_vm9, 1.0, %v2355_v8 }
 0x522   : > { %v1492_v21 = vpack.c.bf16 %v1998_v18, %v1998_v18 }
 0x524   : > { %2221 = vmatmul.mubr.msk.bf16.vlgmr.msra.gmra.mrb[16].mxu1 %vm766_vm0, %v1492_v21 }
 0x525   : > { %2225 = vmatpush3.bf16.msra.mxu1 %v2331_v19  ;;  %2232 = vmatprep.mubr.msk.bf16.mxu1 %vm2356_vm1, %v2355_v8 }
 0x526   : > { %2226 = vmatprep.subr.bf16.mxu1 %v2355_v8 }
 0x529   : > { %2227 = vmatpush3.bf16.msra.mxu1 %v2332_v23 }
 0x52a   : > { %2228 = vmatprep.subr.bf16.mxu1 %v2355_v8 }
 0x52d   : > { %2229 = vmatpush3.bf16.msra.mxu1 %v2333_v24 }
 0x52e   : > { %2230 = vmatprep.subr.bf16.mxu1 %v2355_v8 }
 0x531   : > { %2231 = vmatpush3.bf16.msra.mxu1 %v2334_v25 }
 0x532   : > { %2236 = vmatprep.subr.bf16.mxu1 %v2355_v8 }
 0x534   : > { %2233 = vmatmul.mubr.msk.bf16.vlgmr.msra.gmra.mrb[20].mxu1 %vm984_vm4, %v2550_v20 }
 0x535   : > { %2237 = vmatpush3.bf16.msra.mxu1 %v2335_v26  ;;  %2240 = vmatprep.mubr.msk.bf16.mxu1 %vm2356_vm1, %v2355_v8 }
 0x536   : > { %2238 = vmatprep.subr.bf16.mxu1 %v2355_v8  ;;  %v2337_v8 = vld [vmem:[%s2838_s19] ss:$8 sps:$4 sm:$0xff]  }
 0x539   : > { %2239 = vmatpush3.bf16.msra.mxu1 %v2336_v27 }
 0x53a   : > { %1777 = vmatprep.subr.bf16.mxu1 %v2339_v37 }
 0x5f7   : > { %v1530_v28 = vpop.f32.mrb[16].mxu1 }
 0x5f8   : > { %v1536_v29 = vpack.c.bf16 %v1530_v28, %v1530_v28  ;;  %v2222_v30 = vpop.f32.mrb[17].mxu1 }
 0x5f9   : > { %v1533_v31 = vpop.f32.mrb[18].mxu1 }
 0x5fa   : > { %v2223_v32 = vpop.f32.mrb[19].mxu1  ;;  %2241 = vmatmul.mubr.msk.bf16.vlgmr.msra.gmra.mrb[24].mxu1 %vm916_vm5, %v1536_v29 }
 0x5fb   : > { %1778 = vmatpush1.bf16.msra.mxu1 %v2337_v8  ;;  %1809 = vmatprep.mubr.bf16.mxu1 %v2358_v40 }
 0x5fc   : > { %1779 = vmatprep.subr.bf16.mxu1 %v2342_v38 }
 0x5ff   : > { %1780 = vmatpush1.bf16.msra.mxu1 %v2340_v39 }
 0x607   : > { %v1607_v33 = vpop.f32.mrb[20].mxu1 }
 0x608   : > { %v2234_v20 = vpop.f32.mrb[21].mxu1 }
 0x609   : > { %v1610_v34 = vpop.f32.mrb[22].mxu1 }
 0x60a   : > { %v2235_v35 = vpop.f32.mrb[23].mxu1 }
 0x6cd   : > { %v1662_v22 = vpop.f32.mrb[24].mxu1 }
 0x6ce   : > { %v1663_v41 = vadd.f32 %v1662_v22, %v1607_v33  ;;  %v2242_v42 = vpop.f32.mrb[25].mxu1 }
 0x6cf   : > { %v1665_v44 = vpop.f32.mrb[26].mxu1 }
 0x6d0   : > { %v1728_v45 = vadd.f32 %v2750_v2, %v1663_v41  ;;  %v2243_v46 = vpop.f32.mrb[27].mxu1 }
 0x6d2   : > { %v1736_v47 = vadd.f32 %v2011_v43, %v1728_v45 }
 0x6d4   : > { %v1737_v48 = vpack.c.bf16 %v1736_v47, %v1736_v47 }
 0x6d6   : > { %2016 = vmatmul.mubr.msk.bf16.vlgmr.msra.gmra.mrb[28].mxu1 %vm916_vm5, %v1737_v48 }
 0x7a9   : > { %v1811_v55 = vpop.f32.mrb[28].mxu1 }
 0x7aa   : > { %v1812_v56 = vadd.f32 %v1811_v55, %v1747_v53  ;;  %v1813_v57 = vpop.f32.mrb[29].mxu1 }
 0x7ab   : > { %v1814_v58 = vadd.f32 %v1813_v57, %v1751_v54  ;;  %v1815_v36 = vpop.f32.mrb[30].mxu1 }
 0x7ac   : > { %1818 = vst [vmem:[%s762_s29] sm:$0xff] %v1812_v56  ;;  %v1816_v59 = vpop.f32.mrb[31].mxu1 }
 0x7ad   : > { %1819 = vst [vmem:[%s762_s29 + $0x8] sm:$0xff] %v1814_v58 }
 0x7ae PF: > { %s34_s4 = sadd.s32 1, %s2353_s4  }
 0x7af   : > { %p31_p4 = scmp.ge.s32.totalorder %s34_s4, 4  }
 0x7b1   :  { %33 = sbr.rel (!%p31_p4) target bundleno = 9 (0x9), region = 164 }

</bundles_post_ra>
